<compile_context>
chip_gen: v7x
topology: tpu7x:2x2x1
jax: 0.10.0
libtpu: 0.0.40
codegen_flags: <defaults>
</compile_context>

<pallas_src>
import functools

import jax
import jax.numpy as jnp
from jax import lax
from jax.experimental import pallas as pl
from jax.experimental.pallas import tpu as pltpu

# Make the pure-JAX reference use full-precision matmuls so the numerical
# comparison against the Pallas kernel (f32 MXU) is tight.
jax.config.update("jax_default_matmul_precision", "highest")


def _layer_norm(x, gamma, beta, eps=1e-5):
    """LayerNorm over the last dim (matches nn.LayerNorm defaults)."""
    mu = jnp.mean(x, axis=-1, keepdims=True)
    var = jnp.mean(jnp.square(x - mu), axis=-1, keepdims=True)
    return (x - mu) * lax.rsqrt(var + eps) * gamma + beta


# --------------------------------------------------------------------------
# Pallas kernel: one full EncoderLayer for one batch element.
# --------------------------------------------------------------------------
def _encoder_layer_kernel(x_ref, mask_ref,
                          wq_ref, bq_ref, wo_ref, bo_ref,
                          w1_ref, b1_ref, w2_ref, b2_ref,
                          g1_ref, be1_ref, g2_ref, be2_ref,
                          o_ref, *, num_heads):
    x = x_ref[0]          # (L, D)
    mask = mask_ref[0]    # (H, L, L)
    L, D = x.shape
    depth = D // num_heads
    scale = depth ** -0.5

    # q projection (the original module reuses q for k and v).
    q = jnp.dot(x, wq_ref[...], preferred_element_type=jnp.float32) + bq_ref[...]

    # Per-head attention (num_heads is small & static -> unrolled loop).
    head_outs = []
    for h in range(num_heads):
        qh = q[:, h * depth:(h + 1) * depth]                       # (L, depth)
        # s = qh @ qh^T  (contract last dims of both operands)
        s = lax.dot_general(qh, qh, (((1,), (1,)), ((), ())),
                            preferred_element_type=jnp.float32) * scale
        s = s + mask[h] * (-1e9)
        s = s - jnp.max(s, axis=-1, keepdims=True)                 # stable softmax
        p = jnp.exp(s)
        p = p / jnp.sum(p, axis=-1, keepdims=True)
        head_outs.append(jnp.dot(p, qh, preferred_element_type=jnp.float32))
    ctx = jnp.concatenate(head_outs, axis=-1)                      # (L, D)

    attn_out = jnp.dot(ctx, wo_ref[...],
                       preferred_element_type=jnp.float32) + bo_ref[...]
    # TODO(synk): dropout (p=0.1) omitted -> identity (inference).
    y1 = _layer_norm(x + attn_out, g1_ref[...], be1_ref[...])

    h1 = jnp.maximum(
        jnp.dot(y1, w1_ref[...], preferred_element_type=jnp.float32) + b1_ref[...],
        0.0)
    ffn_out = jnp.dot(h1, w2_ref[...],
                      preferred_element_type=jnp.float32) + b2_ref[...]
    y2 = _layer_norm(y1 + ffn_out, g2_ref[...], be2_ref[...])

    o_ref[0] = y2.astype(o_ref.dtype)


def encoder_layer(x, mask, p, num_heads):
    """One EncoderLayer via a single fused Pallas kernel, gridded over batch."""
    N, L, D = x.shape
    H = num_heads
    dff = p["w1"].shape[1]
    kernel = functools.partial(_encoder_layer_kernel, num_heads=num_heads)
    bcast2 = lambda b: (0, 0)  # weights: same block for every grid step

    return pl.pallas_call(
        kernel,
        out_shape=jax.ShapeDtypeStruct((N, L, D), x.dtype),
        grid=(N,),
        in_specs=[
            pl.BlockSpec((1, L, D), lambda b: (b, 0, 0)),        # x
            pl.BlockSpec((1, H, L, L), lambda b: (b, 0, 0, 0)),  # mask
            pl.BlockSpec((D, D), bcast2),                        # wq
            pl.BlockSpec((1, D), bcast2),                        # bq
            pl.BlockSpec((D, D), bcast2),                        # wo (output proj)
            pl.BlockSpec((1, D), bcast2),                        # bo
            pl.BlockSpec((D, dff), bcast2),                      # ffn w1
            pl.BlockSpec((1, dff), bcast2),                      # ffn b1
            pl.BlockSpec((dff, D), bcast2),                      # ffn w2
            pl.BlockSpec((1, D), bcast2),                        # ffn b2
            pl.BlockSpec((1, D), bcast2),                        # norm1 gamma
            pl.BlockSpec((1, D), bcast2),                        # norm1 beta
            pl.BlockSpec((1, D), bcast2),                        # norm2 gamma
            pl.BlockSpec((1, D), bcast2),                        # norm2 beta
        ],
        out_specs=pl.BlockSpec((1, L, D), lambda b: (b, 0, 0)),
        compiler_params=pltpu.CompilerParams(
            dimension_semantics=("parallel",)),
    )(x, mask, p["wq"], p["bq"], p["wo"], p["bo"],
      p["w1"], p["b1"], p["w2"], p["b2"],
      p["g1"], p["be1"], p["g2"], p["be2"])


def encoder_forward(x, mask, layers_params, num_heads):
    for p in layers_params:
        x = encoder_layer(x, mask, p, num_heads)
    return x


# --------------------------------------------------------------------------
# Pure-JAX reference (mirrors the PyTorch forward, incl. the k=q, v=q reuse).
# --------------------------------------------------------------------------
def encoder_layer_ref(x, mask, p, num_heads):
    N, L, D = x.shape
    depth = D // num_heads
    q = x @ p["wq"] + p["bq"]
    qh = q.reshape(N, L, num_heads, depth).transpose(0, 2, 1, 3)   # (N,H,L,d)
    s = jnp.einsum("nhqd,nhkd->nhqk", qh, qh) * depth ** -0.5
    s = s + mask * (-1e9)
    attn = jax.nn.softmax(s, axis=-1)
    ctx = jnp.einsum("nhqk,nhkd->nhqd", attn, qh)
    ctx = ctx.transpose(0, 2, 1, 3).reshape(N, L, D)
    attn_out = ctx @ p["wo"] + p["bo"]
    y1 = _layer_norm(x + attn_out, p["g1"], p["be1"])
    h1 = jnp.maximum(y1 @ p["w1"] + p["b1"], 0.0)
    ffn_out = h1 @ p["w2"] + p["b2"]
    return _layer_norm(y1 + ffn_out, p["g2"], p["be2"])


def encoder_ref(x, mask, layers_params, num_heads):
    for p in layers_params:
        x = encoder_layer_ref(x, mask, p, num_heads)
    return x


# --------------------------------------------------------------------------
# Parameter init (weights stored as (in, out) so kernels do x @ W + b).
# --------------------------------------------------------------------------
def init_layer_params(key, d_model, dff):
    ks = jax.random.split(key, 8)

    def w(k, shape, fan_in):
        return jax.random.normal(k, shape, jnp.float32) * (fan_in ** -0.5)

    return dict(
        wq=w(ks[0], (d_model, d_model), d_model),
        bq=w(ks[1], (1, d_model), d_model),
        wo=w(ks[2], (d_model, d_model), d_model),
        bo=w(ks[3], (1, d_model), d_model),
        w1=w(ks[4], (d_model, dff), d_model),
        b1=w(ks[5], (1, dff), d_model),
        w2=w(ks[6], (dff, d_model), dff),
        b2=w(ks[7], (1, d_model), dff),
        g1=jnp.ones((1, d_model), jnp.float32),
        be1=jnp.zeros((1, d_model), jnp.float32),
        g2=jnp.ones((1, d_model), jnp.float32),
        be2=jnp.zeros((1, d_model), jnp.float32),
    )


if __name__ == "__main__":
    num_layers, d_model, num_heads, dff = 2, 32, 4, 64
    N, L = 2, 8

    key = jax.random.PRNGKey(0)
    kx, *kl = jax.random.split(key, 1 + num_layers)

    x = jax.random.normal(kx, (N, L, d_model), jnp.float32)

    # Padding-style mask (1.0 = masked key position), same convention as the
    # module's "scaled_qk += mask * -1e9". Mask the last 2 keys of batch 1.
    key_pad = jnp.zeros((N, L), jnp.float32).at[1, -2:].set(1.0)
    mask = jnp.asarray(
        jnp.broadcast_to(key_pad[:, None, None, :], (N, num_heads, L, L)))

    layers_params = [init_layer_params(k, d_model, dff) for k in kl]

    out = encoder_forward(x, mask, layers_params, num_heads)
    out = jax.block_until_ready(out)

    ref = encoder_ref(x, mask, layers_params, num_heads)

    assert out.shape == (N, L, d_model) and out.dtype == x.dtype
    max_err = jnp.max(jnp.abs(out - ref))
    assert jnp.allclose(out, ref, atol=2e-4, rtol=2e-4), f"max abs err {max_err}"
    print("KERNEL_OK")
</pallas_src>

<mosaic_0001>
module attributes {stable_mosaic.version = 11 : i64} {
  func.func @_encoder_layer_kernel(%arg0: i32, %arg1: memref<1x8x32xf32, #tpu.memory_space<vmem>>, %arg2: memref<1x4x8x8xf32, #tpu.memory_space<vmem>>, %arg3: memref<32x32xf32, #tpu.memory_space<vmem>>, %arg4: memref<1x32xf32, #tpu.memory_space<vmem>>, %arg5: memref<32x32xf32, #tpu.memory_space<vmem>>, %arg6: memref<1x32xf32, #tpu.memory_space<vmem>>, %arg7: memref<32x64xf32, #tpu.memory_space<vmem>>, %arg8: memref<1x64xf32, #tpu.memory_space<vmem>>, %arg9: memref<64x32xf32, #tpu.memory_space<vmem>>, %arg10: memref<1x32xf32, #tpu.memory_space<vmem>>, %arg11: memref<1x32xf32, #tpu.memory_space<vmem>>, %arg12: memref<1x32xf32, #tpu.memory_space<vmem>>, %arg13: memref<1x32xf32, #tpu.memory_space<vmem>>, %arg14: memref<1x32xf32, #tpu.memory_space<vmem>>, %arg15: memref<1x8x32xf32, #tpu.memory_space<vmem>>) attributes {dimension_semantics = [#tpu.dimension_semantics<parallel>], iteration_bounds = array<i64: 2>, scalar_prefetch = 0 : i64, scratch_operands = 0 : i64, tpu.core_type = #tpu.core_type<tc>, window_params = [{transform_indices = @transform_0, window_bounds = array<i64: 1, 8, 32>}, {transform_indices = @transform_1, window_bounds = array<i64: 1, 4, 8, 8>}, {pipeline_mode = #tpu.pipeline_mode<synchronous>, transform_indices = @transform_2, window_bounds = array<i64: 32, 32>}, {pipeline_mode = #tpu.pipeline_mode<synchronous>, transform_indices = @transform_3, window_bounds = array<i64: 1, 32>}, {pipeline_mode = #tpu.pipeline_mode<synchronous>, transform_indices = @transform_4, window_bounds = array<i64: 32, 32>}, {pipeline_mode = #tpu.pipeline_mode<synchronous>, transform_indices = @transform_5, window_bounds = array<i64: 1, 32>}, {pipeline_mode = #tpu.pipeline_mode<synchronous>, transform_indices = @transform_6, window_bounds = array<i64: 32, 64>}, {pipeline_mode = #tpu.pipeline_mode<synchronous>, transform_indices = @transform_7, window_bounds = array<i64: 1, 64>}, {pipeline_mode = #tpu.pipeline_mode<synchronous>, transform_indices = @transform_8, window_bounds = array<i64: 64, 32>}, {pipeline_mode = #tpu.pipeline_mode<synchronous>, transform_indices = @transform_9, window_bounds = array<i64: 1, 32>}, {pipeline_mode = #tpu.pipeline_mode<synchronous>, transform_indices = @transform_10, window_bounds = array<i64: 1, 32>}, {pipeline_mode = #tpu.pipeline_mode<synchronous>, transform_indices = @transform_11, window_bounds = array<i64: 1, 32>}, {pipeline_mode = #tpu.pipeline_mode<synchronous>, transform_indices = @transform_12, window_bounds = array<i64: 1, 32>}, {pipeline_mode = #tpu.pipeline_mode<synchronous>, transform_indices = @transform_13, window_bounds = array<i64: 1, 32>}, {transform_indices = @transform_14, window_bounds = array<i64: 1, 8, 32>}]} {
    %c0 = arith.constant 0 : index
    %c0_0 = arith.constant 0 : index
    %c0_1 = arith.constant 0 : index
    %0 = vector.load %arg1[%c0, %c0_0, %c0_1] : memref<1x8x32xf32, #tpu.memory_space<vmem>>, vector<1x8x32xf32>
    %1 = vector.shape_cast %0 : vector<1x8x32xf32> to vector<8x32xf32>
    %c0_2 = arith.constant 0 : index
    %c0_3 = arith.constant 0 : index
    %c0_4 = arith.constant 0 : index
    %c0_5 = arith.constant 0 : index
    %2 = vector.load %arg2[%c0_2, %c0_3, %c0_4, %c0_5] : memref<1x4x8x8xf32, #tpu.memory_space<vmem>>, vector<1x4x8x8xf32>
    %3 = vector.shape_cast %2 : vector<1x4x8x8xf32> to vector<4x8x8xf32>
    %c0_6 = arith.constant 0 : index
    %c0_7 = arith.constant 0 : index
    %4 = vector.load %arg3[%c0_6, %c0_7] : memref<32x32xf32, #tpu.memory_space<vmem>>, vector<32x32xf32>
    %cst = arith.constant dense<0.000000e+00> : vector<8x32xf32>
    %5 = tpu.matmul %1, %4, %cst {dimension_numbers = #tpu.dot_dimension_numbers<[1], [0], [0], [1], [0, 0, 1, 1], [], []>, precision = #tpu.contract_precision<fp32>} : vector<8x32xf32>, vector<32x32xf32>, vector<8x32xf32> -> vector<8x32xf32>
    %c0_8 = arith.constant 0 : index
    %c0_9 = arith.constant 0 : index
    %6 = vector.load %arg4[%c0_8, %c0_9] : memref<1x32xf32, #tpu.memory_space<vmem>>, vector<1x32xf32>
    %7 = vector.broadcast %6 : vector<1x32xf32> to vector<8x32xf32>
    %8 = arith.addf %5, %7 : vector<8x32xf32>
    %9 = vector.extract_strided_slice %8 {offsets = [0, 0], sizes = [8, 8], strides = [1, 1]} : vector<8x32xf32> to vector<8x8xf32>
    %cst_10 = arith.constant dense<0.000000e+00> : vector<8x8xf32>
    %10 = tpu.matmul %9, %9, %cst_10 {dimension_numbers = #tpu.dot_dimension_numbers<[1], [1], [0], [0], [0, 0, 1, 0], [], []>, precision = #tpu.contract_precision<fp32>} : vector<8x8xf32>, vector<8x8xf32>, vector<8x8xf32> -> vector<8x8xf32>
    %cst_11 = arith.constant 0.353553385 : f32
    %11 = vector.broadcast %cst_11 : f32 to vector<8x8xf32>
    %12 = arith.mulf %10, %11 : vector<8x8xf32>
    %13 = vector.extract_strided_slice %3 {offsets = [0, 0, 0], sizes = [1, 8, 8], strides = [1, 1, 1]} : vector<4x8x8xf32> to vector<1x8x8xf32>
    %14 = vector.shape_cast %13 : vector<1x8x8xf32> to vector<8x8xf32>
    %cst_12 = arith.constant -1.000000e+09 : f32
    %15 = vector.broadcast %cst_12 : f32 to vector<8x8xf32>
    %16 = arith.mulf %14, %15 : vector<8x8xf32>
    %17 = arith.addf %12, %16 : vector<8x8xf32>
    %cst_13 = arith.constant dense<0xFF800000> : vector<8xf32>
    %18 = vector.multi_reduction <maximumf>, %17, %cst_13 [1] : vector<8x8xf32> to vector<8xf32>
    %19 = vector.shape_cast %18 : vector<8xf32> to vector<8x1xf32>
    %20 = vector.broadcast %19 : vector<8x1xf32> to vector<8x8xf32>
    %21 = arith.subf %17, %20 : vector<8x8xf32>
    %22 = math.exp %21 : vector<8x8xf32>
    %cst_14 = arith.constant dense<0.000000e+00> : vector<8xf32>
    %23 = vector.multi_reduction <add>, %22, %cst_14 [1] : vector<8x8xf32> to vector<8xf32>
    %24 = vector.shape_cast %23 : vector<8xf32> to vector<8x1xf32>
    %25 = vector.broadcast %24 : vector<8x1xf32> to vector<8x8xf32>
    %26 = arith.divf %22, %25 : vector<8x8xf32>
    %cst_15 = arith.constant dense<0.000000e+00> : vector<8x8xf32>
    %27 = tpu.matmul %26, %9, %cst_15 {dimension_numbers = #tpu.dot_dimension_numbers<[1], [0], [0], [1], [0, 0, 1, 1], [], []>, precision = #tpu.contract_precision<fp32>} : vector<8x8xf32>, vector<8x8xf32>, vector<8x8xf32> -> vector<8x8xf32>
    %28 = vector.extract_strided_slice %8 {offsets = [0, 8], sizes = [8, 8], strides = [1, 1]} : vector<8x32xf32> to vector<8x8xf32>
    %cst_16 = arith.constant dense<0.000000e+00> : vector<8x8xf32>
    %29 = tpu.matmul %28, %28, %cst_16 {dimension_numbers = #tpu.dot_dimension_numbers<[1], [1], [0], [0], [0, 0, 1, 0], [], []>, precision = #tpu.contract_precision<fp32>} : vector<8x8xf32>, vector<8x8xf32>, vector<8x8xf32> -> vector<8x8xf32>
    %cst_17 = arith.constant 0.353553385 : f32
    %30 = vector.broadcast %cst_17 : f32 to vector<8x8xf32>
    %31 = arith.mulf %29, %30 : vector<8x8xf32>
    %32 = vector.extract_strided_slice %3 {offsets = [1, 0, 0], sizes = [1, 8, 8], strides = [1, 1, 1]} : vector<4x8x8xf32> to vector<1x8x8xf32>
    %33 = vector.shape_cast %32 : vector<1x8x8xf32> to vector<8x8xf32>
    %cst_18 = arith.constant -1.000000e+09 : f32
    %34 = vector.broadcast %cst_18 : f32 to vector<8x8xf32>
    %35 = arith.mulf %33, %34 : vector<8x8xf32>
    %36 = arith.addf %31, %35 : vector<8x8xf32>
    %cst_19 = arith.constant dense<0xFF800000> : vector<8xf32>
    %37 = vector.multi_reduction <maximumf>, %36, %cst_19 [1] : vector<8x8xf32> to vector<8xf32>
    %38 = vector.shape_cast %37 : vector<8xf32> to vector<8x1xf32>
    %39 = vector.broadcast %38 : vector<8x1xf32> to vector<8x8xf32>
    %40 = arith.subf %36, %39 : vector<8x8xf32>
    %41 = math.exp %40 : vector<8x8xf32>
    %cst_20 = arith.constant dense<0.000000e+00> : vector<8xf32>
    %42 = vector.multi_reduction <add>, %41, %cst_20 [1] : vector<8x8xf32> to vector<8xf32>
    %43 = vector.shape_cast %42 : vector<8xf32> to vector<8x1xf32>
    %44 = vector.broadcast %43 : vector<8x1xf32> to vector<8x8xf32>
    %45 = arith.divf %41, %44 : vector<8x8xf32>
    %cst_21 = arith.constant dense<0.000000e+00> : vector<8x8xf32>
    %46 = tpu.matmul %45, %28, %cst_21 {dimension_numbers = #tpu.dot_dimension_numbers<[1], [0], [0], [1], [0, 0, 1, 1], [], []>, precision = #tpu.contract_precision<fp32>} : vector<8x8xf32>, vector<8x8xf32>, vector<8x8xf32> -> vector<8x8xf32>
    %47 = vector.extract_strided_slice %8 {offsets = [0, 16], sizes = [8, 8], strides = [1, 1]} : vector<8x32xf32> to vector<8x8xf32>
    %cst_22 = arith.constant dense<0.000000e+00> : vector<8x8xf32>
    %48 = tpu.matmul %47, %47, %cst_22 {dimension_numbers = #tpu.dot_dimension_numbers<[1], [1], [0], [0], [0, 0, 1, 0], [], []>, precision = #tpu.contract_precision<fp32>} : vector<8x8xf32>, vector<8x8xf32>, vector<8x8xf32> -> vector<8x8xf32>
    %cst_23 = arith.constant 0.353553385 : f32
    %49 = vector.broadcast %cst_23 : f32 to vector<8x8xf32>
    %50 = arith.mulf %48, %49 : vector<8x8xf32>
    %51 = vector.extract_strided_slice %3 {offsets = [2, 0, 0], sizes = [1, 8, 8], strides = [1, 1, 1]} : vector<4x8x8xf32> to vector<1x8x8xf32>
    %52 = vector.shape_cast %51 : vector<1x8x8xf32> to vector<8x8xf32>
    %cst_24 = arith.constant -1.000000e+09 : f32
    %53 = vector.broadcast %cst_24 : f32 to vector<8x8xf32>
    %54 = arith.mulf %52, %53 : vector<8x8xf32>
    %55 = arith.addf %50, %54 : vector<8x8xf32>
    %cst_25 = arith.constant dense<0xFF800000> : vector<8xf32>
    %56 = vector.multi_reduction <maximumf>, %55, %cst_25 [1] : vector<8x8xf32> to vector<8xf32>
    %57 = vector.shape_cast %56 : vector<8xf32> to vector<8x1xf32>
    %58 = vector.broadcast %57 : vector<8x1xf32> to vector<8x8xf32>
    %59 = arith.subf %55, %58 : vector<8x8xf32>
    %60 = math.exp %59 : vector<8x8xf32>
    %cst_26 = arith.constant dense<0.000000e+00> : vector<8xf32>
    %61 = vector.multi_reduction <add>, %60, %cst_26 [1] : vector<8x8xf32> to vector<8xf32>
    %62 = vector.shape_cast %61 : vector<8xf32> to vector<8x1xf32>
    %63 = vector.broadcast %62 : vector<8x1xf32> to vector<8x8xf32>
    %64 = arith.divf %60, %63 : vector<8x8xf32>
    %cst_27 = arith.constant dense<0.000000e+00> : vector<8x8xf32>
    %65 = tpu.matmul %64, %47, %cst_27 {dimension_numbers = #tpu.dot_dimension_numbers<[1], [0], [0], [1], [0, 0, 1, 1], [], []>, precision = #tpu.contract_precision<fp32>} : vector<8x8xf32>, vector<8x8xf32>, vector<8x8xf32> -> vector<8x8xf32>
    %66 = vector.extract_strided_slice %8 {offsets = [0, 24], sizes = [8, 8], strides = [1, 1]} : vector<8x32xf32> to vector<8x8xf32>
    %cst_28 = arith.constant dense<0.000000e+00> : vector<8x8xf32>
    %67 = tpu.matmul %66, %66, %cst_28 {dimension_numbers = #tpu.dot_dimension_numbers<[1], [1], [0], [0], [0, 0, 1, 0], [], []>, precision = #tpu.contract_precision<fp32>} : vector<8x8xf32>, vector<8x8xf32>, vector<8x8xf32> -> vector<8x8xf32>
    %cst_29 = arith.constant 0.353553385 : f32
    %68 = vector.broadcast %cst_29 : f32 to vector<8x8xf32>
    %69 = arith.mulf %67, %68 : vector<8x8xf32>
    %70 = vector.extract_strided_slice %3 {offsets = [3, 0, 0], sizes = [1, 8, 8], strides = [1, 1, 1]} : vector<4x8x8xf32> to vector<1x8x8xf32>
    %71 = vector.shape_cast %70 : vector<1x8x8xf32> to vector<8x8xf32>
    %cst_30 = arith.constant -1.000000e+09 : f32
    %72 = vector.broadcast %cst_30 : f32 to vector<8x8xf32>
    %73 = arith.mulf %71, %72 : vector<8x8xf32>
    %74 = arith.addf %69, %73 : vector<8x8xf32>
    %cst_31 = arith.constant dense<0xFF800000> : vector<8xf32>
    %75 = vector.multi_reduction <maximumf>, %74, %cst_31 [1] : vector<8x8xf32> to vector<8xf32>
    %76 = vector.shape_cast %75 : vector<8xf32> to vector<8x1xf32>
    %77 = vector.broadcast %76 : vector<8x1xf32> to vector<8x8xf32>
    %78 = arith.subf %74, %77 : vector<8x8xf32>
    %79 = math.exp %78 : vector<8x8xf32>
    %cst_32 = arith.constant dense<0.000000e+00> : vector<8xf32>
    %80 = vector.multi_reduction <add>, %79, %cst_32 [1] : vector<8x8xf32> to vector<8xf32>
    %81 = vector.shape_cast %80 : vector<8xf32> to vector<8x1xf32>
    %82 = vector.broadcast %81 : vector<8x1xf32> to vector<8x8xf32>
    %83 = arith.divf %79, %82 : vector<8x8xf32>
    %cst_33 = arith.constant dense<0.000000e+00> : vector<8x8xf32>
    %84 = tpu.matmul %83, %66, %cst_33 {dimension_numbers = #tpu.dot_dimension_numbers<[1], [0], [0], [1], [0, 0, 1, 1], [], []>, precision = #tpu.contract_precision<fp32>} : vector<8x8xf32>, vector<8x8xf32>, vector<8x8xf32> -> vector<8x8xf32>
    %85 = tpu.concatenate %27, %46, %65, %84 in 1 : vector<8x8xf32>, vector<8x8xf32>, vector<8x8xf32>, vector<8x8xf32> -> vector<8x32xf32>
    %c0_34 = arith.constant 0 : index
    %c0_35 = arith.constant 0 : index
    %86 = vector.load %arg5[%c0_34, %c0_35] : memref<32x32xf32, #tpu.memory_space<vmem>>, vector<32x32xf32>
    %cst_36 = arith.constant dense<0.000000e+00> : vector<8x32xf32>
    %87 = tpu.matmul %85, %86, %cst_36 {dimension_numbers = #tpu.dot_dimension_numbers<[1], [0], [0], [1], [0, 0, 1, 1], [], []>, precision = #tpu.contract_precision<fp32>} : vector<8x32xf32>, vector<32x32xf32>, vector<8x32xf32> -> vector<8x32xf32>
    %c0_37 = arith.constant 0 : index
    %c0_38 = arith.constant 0 : index
    %88 = vector.load %arg6[%c0_37, %c0_38] : memref<1x32xf32, #tpu.memory_space<vmem>>, vector<1x32xf32>
    %89 = vector.broadcast %88 : vector<1x32xf32> to vector<8x32xf32>
    %90 = arith.addf %87, %89 : vector<8x32xf32>
    %91 = arith.addf %1, %90 : vector<8x32xf32>
    %c0_39 = arith.constant 0 : index
    %c0_40 = arith.constant 0 : index
    %92 = vector.load %arg11[%c0_39, %c0_40] : memref<1x32xf32, #tpu.memory_space<vmem>>, vector<1x32xf32>
    %c0_41 = arith.constant 0 : index
    %c0_42 = arith.constant 0 : index
    %93 = vector.load %arg12[%c0_41, %c0_42] : memref<1x32xf32, #tpu.memory_space<vmem>>, vector<1x32xf32>
    %cst_43 = arith.constant dense<0.000000e+00> : vector<8xf32>
    %94 = vector.multi_reduction <add>, %91, %cst_43 [1] : vector<8x32xf32> to vector<8xf32>
    %95 = vector.shape_cast %94 : vector<8xf32> to vector<8x1xf32>
    %cst_44 = arith.constant 3.200000e+01 : f32
    %96 = vector.broadcast %cst_44 : f32 to vector<8x1xf32>
    %97 = arith.divf %95, %96 : vector<8x1xf32>
    %98 = vector.broadcast %97 : vector<8x1xf32> to vector<8x32xf32>
    %99 = arith.subf %91, %98 : vector<8x32xf32>
    %100 = arith.mulf %99, %99 : vector<8x32xf32>
    %cst_45 = arith.constant dense<0.000000e+00> : vector<8xf32>
    %101 = vector.multi_reduction <add>, %100, %cst_45 [1] : vector<8x32xf32> to vector<8xf32>
    %102 = vector.shape_cast %101 : vector<8xf32> to vector<8x1xf32>
    %cst_46 = arith.constant 3.200000e+01 : f32
    %103 = vector.broadcast %cst_46 : f32 to vector<8x1xf32>
    %104 = arith.divf %102, %103 : vector<8x1xf32>
    %105 = vector.broadcast %97 : vector<8x1xf32> to vector<8x32xf32>
    %106 = arith.subf %91, %105 : vector<8x32xf32>
    %cst_47 = arith.constant 9.99999974E-6 : f32
    %107 = vector.broadcast %cst_47 : f32 to vector<8x1xf32>
    %108 = arith.addf %104, %107 : vector<8x1xf32>
    %109 = math.rsqrt %108 : vector<8x1xf32>
    %110 = vector.broadcast %109 : vector<8x1xf32> to vector<8x32xf32>
    %111 = arith.mulf %106, %110 : vector<8x32xf32>
    %112 = vector.broadcast %92 : vector<1x32xf32> to vector<8x32xf32>
    %113 = arith.mulf %111, %112 : vector<8x32xf32>
    %114 = vector.broadcast %93 : vector<1x32xf32> to vector<8x32xf32>
    %115 = arith.addf %113, %114 : vector<8x32xf32>
    %c0_48 = arith.constant 0 : index
    %c0_49 = arith.constant 0 : index
    %116 = vector.load %arg7[%c0_48, %c0_49] : memref<32x64xf32, #tpu.memory_space<vmem>>, vector<32x64xf32>
    %cst_50 = arith.constant dense<0.000000e+00> : vector<8x64xf32>
    %117 = tpu.matmul %115, %116, %cst_50 {dimension_numbers = #tpu.dot_dimension_numbers<[1], [0], [0], [1], [0, 0, 1, 1], [], []>, precision = #tpu.contract_precision<fp32>} : vector<8x32xf32>, vector<32x64xf32>, vector<8x64xf32> -> vector<8x64xf32>
    %c0_51 = arith.constant 0 : index
    %c0_52 = arith.constant 0 : index
    %118 = vector.load %arg8[%c0_51, %c0_52] : memref<1x64xf32, #tpu.memory_space<vmem>>, vector<1x64xf32>
    %119 = vector.broadcast %118 : vector<1x64xf32> to vector<8x64xf32>
    %120 = arith.addf %117, %119 : vector<8x64xf32>
    %cst_53 = arith.constant 0.000000e+00 : f32
    %121 = vector.broadcast %cst_53 : f32 to vector<8x64xf32>
    %122 = arith.maximumf %120, %121 : vector<8x64xf32>
    %c0_54 = arith.constant 0 : index
    %c0_55 = arith.constant 0 : index
    %123 = vector.load %arg9[%c0_54, %c0_55] : memref<64x32xf32, #tpu.memory_space<vmem>>, vector<64x32xf32>
    %cst_56 = arith.constant dense<0.000000e+00> : vector<8x32xf32>
    %124 = tpu.matmul %122, %123, %cst_56 {dimension_numbers = #tpu.dot_dimension_numbers<[1], [0], [0], [1], [0, 0, 1, 1], [], []>, precision = #tpu.contract_precision<fp32>} : vector<8x64xf32>, vector<64x32xf32>, vector<8x32xf32> -> vector<8x32xf32>
    %c0_57 = arith.constant 0 : index
    %c0_58 = arith.constant 0 : index
    %125 = vector.load %arg10[%c0_57, %c0_58] : memref<1x32xf32, #tpu.memory_space<vmem>>, vector<1x32xf32>
    %126 = vector.broadcast %125 : vector<1x32xf32> to vector<8x32xf32>
    %127 = arith.addf %124, %126 : vector<8x32xf32>
    %128 = arith.addf %115, %127 : vector<8x32xf32>
    %c0_59 = arith.constant 0 : index
    %c0_60 = arith.constant 0 : index
    %129 = vector.load %arg13[%c0_59, %c0_60] : memref<1x32xf32, #tpu.memory_space<vmem>>, vector<1x32xf32>
    %c0_61 = arith.constant 0 : index
    %c0_62 = arith.constant 0 : index
    %130 = vector.load %arg14[%c0_61, %c0_62] : memref<1x32xf32, #tpu.memory_space<vmem>>, vector<1x32xf32>
    %cst_63 = arith.constant dense<0.000000e+00> : vector<8xf32>
    %131 = vector.multi_reduction <add>, %128, %cst_63 [1] : vector<8x32xf32> to vector<8xf32>
    %132 = vector.shape_cast %131 : vector<8xf32> to vector<8x1xf32>
    %cst_64 = arith.constant 3.200000e+01 : f32
    %133 = vector.broadcast %cst_64 : f32 to vector<8x1xf32>
    %134 = arith.divf %132, %133 : vector<8x1xf32>
    %135 = vector.broadcast %134 : vector<8x1xf32> to vector<8x32xf32>
    %136 = arith.subf %128, %135 : vector<8x32xf32>
    %137 = arith.mulf %136, %136 : vector<8x32xf32>
    %cst_65 = arith.constant dense<0.000000e+00> : vector<8xf32>
    %138 = vector.multi_reduction <add>, %137, %cst_65 [1] : vector<8x32xf32> to vector<8xf32>
    %139 = vector.shape_cast %138 : vector<8xf32> to vector<8x1xf32>
    %cst_66 = arith.constant 3.200000e+01 : f32
    %140 = vector.broadcast %cst_66 : f32 to vector<8x1xf32>
    %141 = arith.divf %139, %140 : vector<8x1xf32>
    %142 = vector.broadcast %134 : vector<8x1xf32> to vector<8x32xf32>
    %143 = arith.subf %128, %142 : vector<8x32xf32>
    %cst_67 = arith.constant 9.99999974E-6 : f32
    %144 = vector.broadcast %cst_67 : f32 to vector<8x1xf32>
    %145 = arith.addf %141, %144 : vector<8x1xf32>
    %146 = math.rsqrt %145 : vector<8x1xf32>
    %147 = vector.broadcast %146 : vector<8x1xf32> to vector<8x32xf32>
    %148 = arith.mulf %143, %147 : vector<8x32xf32>
    %149 = vector.broadcast %129 : vector<1x32xf32> to vector<8x32xf32>
    %150 = arith.mulf %148, %149 : vector<8x32xf32>
    %151 = vector.broadcast %130 : vector<1x32xf32> to vector<8x32xf32>
    %152 = arith.addf %150, %151 : vector<8x32xf32>
    %c0_68 = arith.constant 0 : index
    %c0_69 = arith.constant 0 : index
    %c0_70 = arith.constant 0 : index
    %153 = vector.load %arg15[%c0_68, %c0_69, %c0_70] : memref<1x8x32xf32, #tpu.memory_space<vmem>>, vector<1x8x32xf32>
    %154 = vector.shape_cast %153 : vector<1x8x32xf32> to vector<8x32xf32>
    %155 = vector.shape_cast %152 : vector<8x32xf32> to vector<1x8x32xf32>
    tpu.vector_store %arg15[%c0_68, %c0_69, %c0_70], %155 {strides = array<i32>} : memref<1x8x32xf32, #tpu.memory_space<vmem>>, vector<1x8x32xf32>,
    return
  }
  func.func @transform_0(%arg0: i32) -> (i32, i32, i32) {
    %c0_i32 = arith.constant 0 : i32
    %c0_i32_0 = arith.constant 0 : i32
    %c0_i32_1 = arith.constant 0 : i32
    return %arg0, %c0_i32, %c0_i32_0 : i32, i32, i32
  }
  func.func @transform_1(%arg0: i32) -> (i32, i32, i32, i32) {
    %c0_i32 = arith.constant 0 : i32
    %c0_i32_0 = arith.constant 0 : i32
    %c0_i32_1 = arith.constant 0 : i32
    %c0_i32_2 = arith.constant 0 : i32
    return %arg0, %c0_i32, %c0_i32_0, %c0_i32_1 : i32, i32, i32, i32
  }
  func.func @transform_2(%arg0: i32) -> (i32, i32) {
    %c0_i32 = arith.constant 0 : i32
    %c0_i32_0 = arith.constant 0 : i32
    %c0_i32_1 = arith.constant 0 : i32
    return %c0_i32, %c0_i32_0 : i32, i32
  }
  func.func @transform_3(%arg0: i32) -> (i32, i32) {
    %c0_i32 = arith.constant 0 : i32
    %c0_i32_0 = arith.constant 0 : i32
    %c0_i32_1 = arith.constant 0 : i32
    return %c0_i32, %c0_i32_0 : i32, i32
  }
  func.func @transform_4(%arg0: i32) -> (i32, i32) {
    %c0_i32 = arith.constant 0 : i32
    %c0_i32_0 = arith.constant 0 : i32
    %c0_i32_1 = arith.constant 0 : i32
    return %c0_i32, %c0_i32_0 : i32, i32
  }
  func.func @transform_5(%arg0: i32) -> (i32, i32) {
    %c0_i32 = arith.constant 0 : i32
    %c0_i32_0 = arith.constant 0 : i32
    %c0_i32_1 = arith.constant 0 : i32
    return %c0_i32, %c0_i32_0 : i32, i32
  }
  func.func @transform_6(%arg0: i32) -> (i32, i32) {
    %c0_i32 = arith.constant 0 : i32
    %c0_i32_0 = arith.constant 0 : i32
    %c0_i32_1 = arith.constant 0 : i32
    return %c0_i32, %c0_i32_0 : i32, i32
  }
  func.func @transform_7(%arg0: i32) -> (i32, i32) {
    %c0_i32 = arith.constant 0 : i32
    %c0_i32_0 = arith.constant 0 : i32
    %c0_i32_1 = arith.constant 0 : i32
    return %c0_i32, %c0_i32_0 : i32, i32
  }
  func.func @transform_8(%arg0: i32) -> (i32, i32) {
    %c0_i32 = arith.constant 0 : i32
    %c0_i32_0 = arith.constant 0 : i32
    %c0_i32_1 = arith.constant 0 : i32
    return %c0_i32, %c0_i32_0 : i32, i32
  }
  func.func @transform_9(%arg0: i32) -> (i32, i32) {
    %c0_i32 = arith.constant 0 : i32
    %c0_i32_0 = arith.constant 0 : i32
    %c0_i32_1 = arith.constant 0 : i32
    return %c0_i32, %c0_i32_0 : i32, i32
  }
  func.func @transform_10(%arg0: i32) -> (i32, i32) {
    %c0_i32 = arith.constant 0 : i32
    %c0_i32_0 = arith.constant 0 : i32
    %c0_i32_1 = arith.constant 0 : i32
    return %c0_i32, %c0_i32_0 : i32, i32
  }
  func.func @transform_11(%arg0: i32) -> (i32, i32) {
    %c0_i32 = arith.constant 0 : i32
    %c0_i32_0 = arith.constant 0 : i32
    %c0_i32_1 = arith.constant 0 : i32
    return %c0_i32, %c0_i32_0 : i32, i32
  }
  func.func @transform_12(%arg0: i32) -> (i32, i32) {
    %c0_i32 = arith.constant 0 : i32
    %c0_i32_0 = arith.constant 0 : i32
    %c0_i32_1 = arith.constant 0 : i32
    return %c0_i32, %c0_i32_0 : i32, i32
  }
  func.func @transform_13(%arg0: i32) -> (i32, i32) {
    %c0_i32 = arith.constant 0 : i32
    %c0_i32_0 = arith.constant 0 : i32
    %c0_i32_1 = arith.constant 0 : i32
    return %c0_i32, %c0_i32_0 : i32, i32
  }
  func.func @transform_14(%arg0: i32) -> (i32, i32, i32) {
    %c0_i32 = arith.constant 0 : i32
    %c0_i32_0 = arith.constant 0 : i32
    %c0_i32_1 = arith.constant 0 : i32
    return %arg0, %c0_i32, %c0_i32_0 : i32, i32, i32
  }
}

</mosaic_0001>

<bundles_post_ra>
// kernel: tpu_custom_call.1
= control target key start
LH: loop header
LB: loop body
LE: loop exit
PB: predicated region body
PF: predicated region fallthrough
CT: control target
= control target key end

     0   :  { %s8594_s0 = inlined_call_operand.hbm [shape: f32[2,8,32], index: 0, kind: input, shape index: {}]   ;;  %s8595_s1 = inlined_call_operand.vmem [shape: f32[2,4,8,8], index: 1, kind: input, shape index: {}]   ;;  %s8596_s2 = inlined_call_operand.vmem [shape: f32[32,32], index: 2, kind: input, shape index: {}]   ;;  %s8597_s3 = inlined_call_operand.vmem [shape: f32[1,32], index: 3, kind: input, shape index: {}]   ;;  %s8598_s4 = inlined_call_operand.hbm [shape: f32[32,32], index: 4, kind: input, shape index: {}]   ;;  %s8599_s5 = inlined_call_operand.vmem [shape: f32[1,32], index: 5, kind: input, shape index: {}]   ;;  %s8600_s6 = inlined_call_operand.hbm [shape: f32[32,64], index: 6, kind: input, shape index: {}]   ;;  %s8601_s7 = inlined_call_operand.vmem [shape: f32[1,64], index: 7, kind: input, shape index: {}]   ;;  %s8602_s8 = inlined_call_operand.vmem [shape: f32[64,32], index: 8, kind: input, shape index: {}]   ;;  %s8603_s9 = inlined_call_operand.vmem [shape: f32[1,32], index: 9, kind: input, shape index: {}]   ;;  %s8604_s10 = inlined_call_operand.vmem [shape: f32[1,32], index: 10, kind: input, shape index: {}]   ;;  %s8605_s11 = inlined_call_operand.vmem [shape: f32[1,32], index: 11, kind: input, shape index: {}]   ;;  %s8606_s12 = inlined_call_operand.vmem [shape: f32[1,32], index: 12, kind: input, shape index: {}]   ;;  %s8607_s13 = inlined_call_operand.vmem [shape: f32[1,32], index: 13, kind: input, shape index: {}]   ;;  %s8608_s14 = inlined_call_operand.hbm [shape: f32[2,8,32], index: 14, kind: output, shape index: {}]  }
   0x1   :  { %8615 = sst [smem:[#allocation14_spill]] %s8594_s0 }
   0x2   :  { %8616 = sst [smem:[#allocation15_spill]] %s8595_s1 }
   0x3   :  { %8617 = sst [smem:[#allocation16_spill]] %s8603_s9 }
   0x4   :  { %8618 = sst [smem:[#allocation17_spill]] %s8606_s12 }
   0x5   :  { %8619 = sst [smem:[#allocation18_spill]] %s8607_s13 }
   0x6   :  { %8620 = sst [smem:[#allocation19_spill]] %s8608_s14 }
   0x7   :  { %19 = vsyncpa [#allocation3], 0 }
   0x8   :  { %21 = vsyncpa [#allocation3 + $0x1], 0 }
   0x9   :  { %22 = vsyncpa [#allocation6], 0 }
   0xa   :  { %23 = vsyncpa [#allocation4], 0 }
   0xb   :  { %25 = vsyncpa [#allocation4 + $0x1], 0  ;;  %s7888_s29 = smov 0   ;;  %s7890_s30 = smov 0  }
   0xc   :  { %s7892_s15 = smov 0   ;;  %s7894_s16 = smov 0  }
   0xd LB: > { %8621 = sst [smem:[#allocation12_spill]] %s7784_s29  ;;  %s7909_s17 = sadd.s32 4294967295, %s7796_s16   ;;  %s7796_s16 = sphi %s7894_s16, %s8647_s16   ;;  %s7792_s15 = sphi %s7892_s15, %s8646_s15   ;;  %s7788_s30 = sphi %s7890_s30, %s8645_s30   ;;  %s7784_s29 = sphi %s7888_s29, %s8644_s29  }
   0xe   : > { %s6441_s18 = sadd.s32 4294967294, %s7796_s16   ;;  %p51_p0 = scmp.ne.s32.totalorder %s7788_s30, %s7784_s29 }
   0xf   : > { %p8612_p1 = scmp.eq.s32.totalorder %s7909_s17, 0  ;;  %p359_p3 = scmp.eq.s32.totalorder %s6441_s18, 1 }
  0x10   : > { %p6442_p5 = scmp.ge.s32.totalorder %s7796_s16, 1  ;;  %p366_p7 = scmp.lt.s32.totalorder %s7796_s16, 3 }
  0x11   : > { %p7918_p4 = por %p8612_p1, %p51_p0  ;;  %p7923_p6 = por %p359_p3, %p51_p0 }
  0x12   : > { %p7928_p8 = pnand %p6442_p5, %p366_p7  ;;  %s7798_s22 = smov [#allocation5]  }
  0x13   : > { %s8622_s19 = scalar_select %p7918_p4, 1, 0 }
  0x14   : > { %s8623_s20 = scalar_select %p7923_p6, 1, 0 }
  0x15   : > { %s384_s23 = sshll.u32 %s7798_s22, 4  ;;  %p7553_p9 = pneg %p7928_p8  ;;  %s7932_s23 = int_to_ptr.vmem [resolvable:$true] %s384_s23 }
  0x16   : > { %8624 = sst [smem:[#allocation13_spill]] %s8623_s20  ;;  %s7799_s25 = smov [#allocation7]  }
  0x17   : > { %p7939_p11 = pnand %p7553_p9, %p8612_p1  ;;  %s400_s26 = sshll.u32 %s7799_s25, 4  ;;  %s7943_s26 = int_to_ptr.vmem [resolvable:$true] %s400_s26 }
  0x18   : > { %s7640_s18 = scalar_lea.hbm %s8598_s4, 512 }
  0x19   : > { %p7641_p12 = scmp.ne.s32.totalorder %s8598_s4, %s7640_s18  ;;  %p7642_p13 = pneg %p7939_p11 }
  0x1a   : > { %p7647_p5 = scmp.lt.u32.totalorder %s7640_s18, %s8598_s4 }
  0x1b   : > { %p7643_p0 = pnand %p7642_p13, %p7641_p12 }
  0x1d   : > { %p7644_p3 = pneg %p7643_p0 }
  0x1f   : > { %p7649_p7 = pnand %p7647_p5, %p7644_p3 }
  0x21   : > { %7652 = shalt.err (!%p7649_p7)
}
  0x22   : > { %s7653_s25 = scalar_lea.vmem %s7932_s23, 512  ;;  %p7661_p2 = scmp.lt.s32.totalorder %s7932_s23, %s7932_s23 }
  0x23   : > { %p7654_p9 = scmp.ne.s32.totalorder %s7932_s23, %s7653_s25  ;;  %p7662_p12 = scmp.lt.s32.totalorder %s7653_s25, %s7653_s25 }
  0x25   : > { %p7656_p10 = pnand %p7654_p9, %p7642_p13  ;;  %p7663_p0 = por %p7662_p12, %p7661_p2 }
  0x27   : > { %p7657_p1 = pneg %p7656_p10 }
  0x29   : > { %p7664_p6 = pnand %p7663_p0, %p7657_p1 }
  0x2b   : > { %7667 = shalt.err (!%p7664_p6)
}
  0x2c   : > { %s7800_s14 = smov 128   ;;  %s7801_s29 = smov 8  }
  0x2d   : > { %7556 = dma.hbm_to_vmem [thread:$0]  (!%p7939_p11), %s8598_s4, 512, %s7932_s23, [#allocation6], %s7800_s14, %s7800_s14, %s7801_s29  }
  0x2e   : > { %s7668_s22 = scalar_lea.hbm %s8600_s6, 512 }
  0x2f   : > { %p7669_p2 = scmp.ne.s32.totalorder %s8600_s6, %s7668_s22  ;;  %p7675_p10 = scmp.lt.u32.totalorder %s7668_s22, %s8600_s6 }
  0x31   : > { %p7671_p1 = pnand %p7669_p2, %p7642_p13 }
  0x33   : > { %p7672_p6 = pneg %p7671_p1 }
  0x35   : > { %p7677_p3 = pnand %p7675_p10, %p7672_p6 }
  0x37   : > { %7680 = shalt.err (!%p7677_p3)
}
  0x38   : > { %s7681_s23 = scalar_lea.vmem %s7943_s26, 512  ;;  %p7689_p12 = scmp.lt.s32.totalorder %s7943_s26, %s7943_s26 }
  0x39   : > { %p7682_p5 = scmp.ne.s32.totalorder %s7943_s26, %s7681_s23  ;;  %p7690_p0 = scmp.lt.s32.totalorder %s7681_s23, %s7681_s23 }
  0x3b   : > { %p7684_p7 = pnand %p7682_p5, %p7642_p13  ;;  %p7691_p2 = por %p7690_p0, %p7689_p12 }
  0x3d   : > { %p7685_p9 = pneg %p7684_p7 }
  0x3f   : > { %p7692_p1 = pnand %p7691_p2, %p7685_p9 }
  0x41   : > { %7695 = shalt.err (!%p7692_p1)
}
  0x42   : > { %7559 = dma.hbm_to_vmem [thread:$0]  (!%p7939_p11), %s8600_s6, 512, %s7943_s26, [#allocation6], %s7800_s14, %s7800_s14, %s7801_s29  }
  0x43   : > { %s7998_s13 = sadd.s32 1, %s7796_s16   ;;  %s38_s24 = sadd.s32 1, %s7792_s15 }
  0x44   : > { %s35_s20 = ssub.s32 %s7796_s16, %s7998_s13  ;;  %p45_p13 = scmp.ne.s32.totalorder %s7792_s15, %s7788_s30 }
  0x45   : > { %p36_p6 = scmp.eq.s32.totalorder %s35_s20, 0  ;;  %p46_p10 = scmp.eq.s32.totalorder %s7796_s16, 0 }
  0x46   : > { %p8627_p3 = scmp.eq.s32.totalorder %s7909_s17, 1  ;;  %p7570_p7 = scmp.lt.s32.totalorder %s7796_s16, 2 }
  0x47   : > { %s8014_s28 = scalar_select %p36_p6, %s7792_s15, %s38_s24  }
  0x48   : > { %p8008_p5 = por %p8627_p3, %p45_p13  ;;  %p47_p9 = por %p46_p10, %p45_p13 }
  0x49   : > { %s435_s18 = sand.u32 1, %s7792_s15   ;;  %s6447_s26 = sshll.u32 %s7796_s16, 7 }
  0x4a   : > { %s8628_s27 = scalar_select %p8008_p5, 1, 0 }
  0x4b   : > { %s6446_s22 = sshll.u32 %s435_s18, 3  ;;  %s8629_s0 = sld [smem:[#allocation14_spill]] }
  0x4c   : > { %s439_s23 = scalar_lea.vmem [#allocation2], %s6446_s22  ;;  %p8025_p11 = pnand %p7570_p7, %p47_p9 }
  0x4d   : > { %s446_s9 = sshll.u32 %s439_s23, 4  ;;  %s436_s24 = scalar_lea.sflag [#allocation3], %s435_s18  ;;  %s8023_s9 = int_to_ptr.vmem [resolvable:$true] %s446_s9 }
  0x4e   : > { %p7698_p0 = pneg %p8025_p11 }
  0x51   : > { %s8021_s25 = scalar_lea.hbm %s8629_s0, %s6447_s26  ;;  %s7701_s14 = scalar_lea.hbm %s8629_s0, 256 }
  0x52   : > { %s7696_s20 = scalar_lea.hbm %s8021_s25, 128  ;;  %p7702_p13 = scmp.lt.u32.totalorder %s8021_s25, %s8629_s0 }
  0x53   : > { %p7697_p12 = scmp.ne.s32.totalorder %s8021_s25, %s7696_s20  ;;  %p7703_p6 = scmp.lt.u32.totalorder %s7701_s14, %s7696_s20 }
  0x54   : > { %p7705_p3 = scmp.lt.u32.totalorder %s7696_s20, %s8021_s25 }
  0x55   : > { %p7699_p2 = pnand %p7698_p0, %p7697_p12  ;;  %p7704_p10 = por %p7703_p6, %p7702_p13 }
  0x57   : > { %p7700_p1 = pneg %p7699_p2  ;;  %p7706_p7 = por %p7705_p3, %p7704_p10 }
  0x59   : > { %p7707_p9 = pnand %p7706_p7, %p7700_p1 }
  0x5b   : > { %7710 = shalt.err (!%p7707_p9)
}
  0x5c   : > { %s7711_s18 = scalar_lea.vmem %s8023_s9, 128  ;;  %s7802_s26 = smov [#allocation2]  }
  0x5d   : > { %p7712_p12 = scmp.ne.s32.totalorder %s8023_s9, %s7711_s18  ;;  %s7716_s22 = sshll.u32 %s7802_s26, 4  ;;  %s7717_s22 = int_to_ptr.vmem [resolvable:$false] %s7716_s22 }
  0x5e   : > { %s7718_s29 = scalar_lea.vmem %s7717_s22, 256  ;;  %p7719_p4 = scmp.lt.s32.totalorder %s8023_s9, %s7717_s22 }
  0x5f   : > { %p7714_p2 = pnand %p7712_p12, %p7698_p0  ;;  %p7720_p13 = scmp.lt.s32.totalorder %s7718_s29, %s7711_s18 }
  0x61   : > { %p7715_p5 = pneg %p7714_p2  ;;  %p7721_p6 = por %p7720_p13, %p7719_p4 }
  0x63   : > { %p7722_p10 = pnand %p7721_p6, %p7715_p5 }
  0x65   : > { %7725 = shalt.err (!%p7722_p10)
}
  0x66   : > { %7563 = dma.hbm_to_vmem [thread:$0]  (!%p8025_p11), %s8021_s25, 128, %s8023_s9, %s436_s24  }
  0x67   : > { %463 = sbr.rel (%p7928_p8) target bundleno = 2972 (0xb9c), region = 76  ;;  %s8057_s20 = sand.u32 (!%p7928_p8), 1, %s7788_s30  }
  0x68   : > { %s6449_s14 = sshll.u32 (!%p7928_p8), %s8057_s20, 3  ;;  %s466_s23 = scalar_lea.sflag (!%p7928_p8), [#allocation3], %s8057_s20 }
  0x69   : > { %s8063_s18 = scalar_lea.vmem (!%p7928_p8), [#allocation2], %s6449_s14  ;;  %p8631_p4 = scmp.ne.s32.totalorder (!%p7928_p8), %s8622_s19, 0 }
  0x6e   : > { %7771 = dma.done.wait (%p8631_p4), %s466_s23, 128  }
  0x6f   : > { %7773 = vsyncadd (%p8631_p4), %s466_s23, 4294967168  ;;  %p8632_p5 = scmp.eq.s32.totalorder %s7909_s17, 0 }
  0x71   : > { %7775 = dma.done.wait (%p8632_p5), [#allocation6], 1024   ;;  %p8633_p8 = pmov %p8632_p5 }
  0x72   : > { %v7803_v0 = vmov 0.0|0.0   ;;  %vm7804_vm0 = vmmov 0   ;;  %v7805_v1 = vmov 0.0   ;;  %vm548_vm1 = vcmask 261120   ;;  %v537_v2 = vld [vmem:[%s8596_s2] sm:$0xff]  ;;  %v538_v3 = vld [vmem:[%s8596_s2 + $0x8] sm:$0xff] }
  0x73   : > { %7777 = vsyncadd (%p8633_p8), [#allocation6], 4294966272  ;;  %7266 = vmatprep.subr.bf16.mxu0 %v7803_v0  ;;  %6727 = vmatprep.mubr.msk.f32.mxu0 %vm7804_vm0, %v7805_v1  ;;  %v539_v4 = vld [vmem:[%s8596_s2 + $0x10] sm:$0xff]  ;;  %v553_v5 = vand.u32 4294901760, %v537_v2  ;;  %v556_v6 = vand.u32 4294901760, %v538_v3  ;;  %v540_v7 = vld [vmem:[%s8596_s2 + $0x18] sm:$0xff] }
  0x74   : > { %7260 = vmatprep.subr.bf16.mxu1 %v7803_v0  ;;  %6716 = vmatprep.mubr.msk.f32.mxu1 %vm7804_vm0, %v7805_v1  ;;  %v559_v8 = vand.u32 4294901760, %v539_v4  ;;  %v532_v9 = vld [vmem:[%s8063_s18] sm:$0xff]  ;;  %v562_v10 = vand.u32 4294901760, %v540_v7  ;;  %vm1037_vm2 = vcmask 64512   ;;  %s7806_s19 = smov 104   ;;  %s7807_s21 = smov 120  }
  0x75   : > { %v550_v11 = vsel %vm548_vm1, %v532_v9, 0  ;;  %v633_v12 = vsub.f32 %v537_v2, %v553_v5  ;;  %v640_v13 = vsub.f32 %v538_v3, %v556_v6  ;;  %v7261_v17 = vpack.c.bf16 %v556_v6, %v553_v5  ;;  %v6455_v43 = vld [vmem:[%s8597_s3] ss:$0 sm:$0xff]  ;;  %s7808_s25 = smov 112   ;;  %p527_p11 = scmp.lt.s32.totalorder %s7909_s17, 1 }
  0x76   : > { %v647_v14 = vsub.f32 %v539_v4, %v559_v8  ;;  %v654_v15 = vsub.f32 %v540_v7, %v562_v10  ;;  %v621_v16 = vand.u32 4294901760, %v550_v11  ;;  %v7264_v27 = vpack.c.bf16 %v562_v10, %v559_v8  ;;  %s8634_s1 = sld [smem:[#allocation15_spill]]  ;;  %s7809_s29 = smov 8  }
  0x77   : > { %v634_v18 = vand.u32 4294901760, %v633_v12  ;;  %v641_v19 = vand.u32 4294901760, %v640_v13  ;;  %7262 = vmatpush3.bf16.msra.mxu1 %v7261_v17  ;;  %v7273_v37 = vpack.c.bf16 %v640_v13, %v633_v12  ;;  %s528_s9 = scalar_select %p527_p11, %s7909_s17, 1  ;;  %vm4705_vm3 = vcmask 130048  }
  0x78   : > { %v648_v20 = vand.u32 4294901760, %v647_v14  ;;  %v655_v21 = vand.u32 4294901760, %v654_v15  ;;  %v622_v22 = vsub.f32 %v550_v11, %v621_v16  ;;  %7263 = vmatprep.subr.bf16.mxu1 %v7803_v0  ;;  %v7276_v38 = vpack.c.bf16 %v654_v15, %v647_v14  ;;  %s7810_s23 = smov 16   ;;  %s8638_s0 = sld [smem:[#allocation19_spill]] }
  0x79   : > { %v635_v23 = vsub.f32 %v633_v12, %v634_v18  ;;  %v642_v24 = vsub.f32 %v640_v13, %v641_v19  ;;  %v7285_v39 = vpack.c.bf16 %v641_v19, %v634_v18  ;;  %s6467_s12 = sshll.u32 %s528_s9, 5  ;;  %vm4707_vm4 = vcmask 195584   ;;  %s6327_s24 = scalar_lea.sflag [#allocation4], %s8057_s20 }
  0x7a   : > { %v649_v25 = vsub.f32 %v647_v14, %v648_v20  ;;  %v656_v26 = vsub.f32 %v654_v15, %v655_v21  ;;  %v623_v28 = vand.u32 4294901760, %v622_v22  ;;  %v7288_v40 = vpack.c.bf16 %v655_v21, %v648_v20  ;;  %p8639_p1 = scmp.ne.s32.totalorder %s8628_s27, 0 }
  0x7b   : > { %v636_v29 = vand.u32 4294901760, %v635_v23  ;;  %v643_v30 = vand.u32 4294901760, %v642_v24  ;;  %7265 = vmatpush3.bf16.msra.mxu1 %v7264_v27  ;;  %vm5754_vm5 = vcmask 523264  }
  0x7c   : > { %v650_v31 = vand.u32 4294901760, %v649_v25  ;;  %v657_v32 = vand.u32 4294901760, %v656_v26  ;;  %v624_v33 = vsub.f32 %v622_v22, %v623_v28  ;;  %6774 = vmatprep.subr.mxu1 %v7805_v1  ;;  %s8219_s22 = scalar_lea.vmem %s8634_s1, %s6467_s12  ;;  %s8635_s12 = sld [smem:[#allocation16_spill]] }
  0x7d   : > { %v7267_v34 = vpack.c.bf16 %v643_v30, %v636_v29  ;;  %v533_v14 = vld [vmem:[%s8219_s22] sm:$0xff]  ;;  %v534_v21 = vld [vmem:[%s8219_s22 + $0x8] sm:$0xff] }
  0x7e   : > { %v625_v35 = vand.u32 4294901760, %v624_v33  ;;  %v7270_v36 = vpack.c.bf16 %v657_v32, %v650_v31  ;;  %v1488_v15 = vmul.f32 -1e+09, %v533_v14  ;;  %v535_v31 = vld [vmem:[%s8219_s22 + $0x10] sm:$0xff] }
  0x7f   : > { %7268 = vmatpush3.bf16.msra.mxu0 %v7267_v34  ;;  %v3315_v32 = vmul.f32 -1e+09, %v535_v31 }
  0x80   : > { %7269 = vmatprep.subr.bf16.mxu0 %v7803_v0  ;;  %6717 = vmatmul.mubr.f32.vlgmr.msra.gmra.mrb[0].mxu1 %v625_v35 }
  0x81   : > { %6776 = vmatprep.mubr.msk.f32.mxu1 %vm7804_vm0, %v7805_v1 }
  0x83   : > { %7271 = vmatpush3.bf16.msra.mxu0 %v7270_v36 }
  0x84   : > { %7272 = vmatprep.subr.bf16.mxu0 %v7803_v0 }
  0x86   : > { %6728 = vmatmul.mubr.f32.vlgmr.msra.gmra.mrb[0].mxu0 %v621_v16 }
  0x87   : > { %7274 = vmatpush3.bf16.msra.mxu0 %v7273_v37  ;;  %6738 = vmatprep.mubr.msk.f32.mxu0 %vm7804_vm0, %v7805_v1 }
  0x88   : > { %7275 = vmatprep.subr.bf16.mxu0 %v7803_v0 }
  0x8b   : > { %7277 = vmatpush3.bf16.msra.mxu0 %v7276_v38 }
  0x8c   : > { %7278 = vmatprep.subr.bf16.mxu0 %v7803_v0 }
  0x8e   : > { %6739 = vmatmul.mubr.f32.vlgmr.msra.gmra.mrb[0].mxu0 %v622_v22  ;;  %v2401_v22 = vmul.f32 -1e+09, %v534_v21 }
  0x8f   : > { %7280 = vmatpush3.bf16.msra.mxu0 %v7261_v17  ;;  %6749 = vmatprep.mubr.msk.f32.mxu0 %vm7804_vm0, %v7805_v1 }
  0x90   : > { %7281 = vmatprep.subr.bf16.mxu0 %v7803_v0 }
  0x93   : > { %7283 = vmatpush3.bf16.msra.mxu0 %v7264_v27 }
  0x94   : > { %7284 = vmatprep.subr.bf16.mxu0 %v7803_v0 }
  0x96   : > { %6750 = vmatmul.mubr.f32.vlgmr.msra.gmra.mrb[0].mxu0 %v623_v28 }
  0x97   : > { %7286 = vmatpush3.bf16.msra.mxu0 %v7285_v39  ;;  %6760 = vmatprep.mubr.msk.f32.mxu0 %vm7804_vm0, %v7805_v1 }
  0x98   : > { %7287 = vmatprep.subr.bf16.mxu0 %v7803_v0 }
  0x9b   : > { %7289 = vmatpush3.bf16.msra.mxu0 %v7288_v40  ;;  %v536_v40 = vld [vmem:[%s8219_s22 + $0x18] sm:$0xff]  ;;  %s8636_s22 = sld [smem:[#allocation17_spill]] }
  0x9c   : > { %7290 = vmatprep.subr.bf16.mxu0 %v7803_v0 }
  0x9e   : > { %6761 = vmatmul.mubr.f32.vlgmr.msra.gmra.mrb[0].mxu0 %v621_v16 }
  0x9f   : > { %7292 = vmatpush3.bf16.msra.mxu0 %v7261_v17  ;;  %6771 = vmatprep.mubr.msk.f32.mxu0 %vm7804_vm0, %v7805_v1 }
  0xa0   : > { %7293 = vmatprep.subr.bf16.mxu0 %v7803_v0 }
  0xa3   : > { %7295 = vmatpush3.bf16.msra.mxu0 %v7264_v27 }
  0xa4   : > { %6834 = vmatprep.subr.mxu0 %v7805_v1 }
  0xa6   : > { %6772 = vmatmul.mubr.f32.vlgmr.msra.gmra.mrb[0].mxu0 %v621_v16 }
  0xa7   : > { %6836 = vmatprep.mubr.msk.f32.mxu0 %vm7804_vm0, %v7805_v1 }
 0x153   : > { %v627_v41 = vpop.f32.mrb[0].mxu1 }
 0x154   : > { %v6718_v42 = vpop.f32.mrb[1].mxu1  ;;  %v628_v44 = vadd.f32 %v6455_v43, %v627_v41  ;;  %v4229_v41 = vmul.f32 -1e+09, %v536_v40 }
 0x179   : > { %v1033_v45 = vpop.f32.mrb[0].mxu0 }
 0x17a   : > { %v8120_v46 = vadd.f32 %v1033_v45, %v628_v44  ;;  %v6773_v47 = vpop.f32.mrb[1].mxu0 }
 0x17c   : > { %v1039_v48 = vsel %vm1037_vm2, %v8120_v46, 0  ;;  %3778 = vrot.lane.b32.xlu1 %v8120_v46, %s7806_s19  ;;  %1950 = vrot.lane.b32.xlu0 %v8120_v46, %s7807_s21  ;;  %v8144_v54 = vand.u32 4294901760, %v8120_v46  ;;  %s7811_s19 = smov 24   ;;  %s6464_s21 = sshll.u32 %s7909_s17, 7 }
 0x17d   : > { %v1042_v49 = vand.u32 4294901760, %v1039_v48  ;;  %s8549_s1 = scalar_lea.hbm %s8638_s0, %s6464_s21  ;;  %s7812_s17 = smov [#allocation8]  }
 0x17f   : > { %6775 = vmatpush3.xpose.msra.mxu1 %v1042_v49  ;;  %v1108_v50 = vsub.f32 %v1039_v48, %v1042_v49 }
 0x180   : > { %2864 = vrot.lane.b32.xlu0 %v8120_v46, %s7808_s25  ;;  %6779 = vmatprep.subr.mxu1 %v7805_v1  ;;  %s526_s25 = scalar_lea.vmem [#allocation8], %s6449_s14  ;;  %s7730_s14 = sshll.u32 %s7812_s17, 4  ;;  %s7731_s14 = int_to_ptr.vmem [resolvable:$false] %s7730_s14 }
 0x181   : > { %v1109_v51 = vand.u32 4294901760, %v1108_v50 }
 0x183   : > { %v1110_v52 = vsub.f32 %v1108_v50, %v1109_v51 }
 0x185   : > { %v1111_v53 = vand.u32 4294901760, %v1110_v52 }
 0x187   : > { %6777 = vmatmul.mubr.f32.vlgmr.msra.gmra.mrb[2].mxu1 %v1111_v53 }
 0x188   : > { %6780 = vmatpush3.xpose.msra.mxu1 %v1111_v53  ;;  %6781 = vmatprep.mubr.msk.f32.mxu1 %vm7804_vm0, %v7805_v1 }
 0x189   : > { %6784 = vmatprep.subr.mxu1 %v7805_v1 }
 0x18f   : > { %6782 = vmatmul.mubr.f32.vlgmr.msra.gmra.mrb[2].mxu1 %v1042_v49 }
 0x190   : > { %6785 = vmatpush3.xpose.msra.mxu1 %v1108_v50  ;;  %6786 = vmatprep.mubr.msk.f32.mxu1 %vm7804_vm0, %v7805_v1 }
 0x191   : > { %6789 = vmatprep.subr.mxu1 %v7805_v1 }
 0x197   : > { %6787 = vmatmul.mubr.f32.vlgmr.msra.gmra.mrb[2].mxu1 %v1108_v50 }
 0x198   : > { %6790 = vmatpush3.xpose.msra.mxu1 %v1042_v49  ;;  %6791 = vmatprep.mubr.msk.f32.mxu1 %vm7804_vm0, %v7805_v1 }
 0x199   : > { %6794 = vmatprep.subr.mxu1 %v7805_v1 }
 0x19f   : > { %6792 = vmatmul.mubr.f32.vlgmr.msra.gmra.mrb[2].mxu1 %v1109_v51 }
 0x1a0   : > { %6795 = vmatpush3.xpose.msra.mxu1 %v1109_v51  ;;  %6796 = vmatprep.mubr.msk.f32.mxu1 %vm7804_vm0, %v7805_v1 }
 0x1a1   : > { %6799 = vmatprep.subr.mxu1 %v7805_v1 }
 0x1a7   : > { %6797 = vmatmul.mubr.f32.vlgmr.msra.gmra.mrb[2].mxu1 %v1042_v49 }
 0x1a8   : > { %6800 = vmatpush3.xpose.msra.mxu1 %v1042_v49  ;;  %6801 = vmatprep.mubr.msk.f32.mxu1 %vm7804_vm0, %v7805_v1 }
 0x1a9   : > { %6804 = vmatprep.subr.mxu1 %v7805_v1 }
 0x1af   : > { %6802 = vmatmul.mubr.f32.vlgmr.msra.gmra.mrb[2].mxu1 %v1042_v49 }
 0x1b0   : > { %6805 = vmatpush3.msra.mxu1 %v8144_v54  ;;  %6806 = vmatprep.mubr.msk.f32.mxu1 %vm7804_vm0, %v7805_v1 }
 0x1b1   : > { %6809 = vmatprep.subr.mxu1 %v7805_v1 }
 0x1ee   : > { %v8150_v55 = vpop.permute.xlu0 %1950  ;;  %v8186_v7 = vpop.permute.xlu1 %3778 }
 0x1ef   : > { %v1952_v56 = vsel %vm1037_vm2, %v8150_v55, 0  ;;  %v3780_v8 = vsel %vm1037_vm2, %v8186_v7, 0 }
 0x1f0   : > { %v1955_v57 = vand.u32 4294901760, %v1952_v56  ;;  %v3783_v9 = vand.u32 4294901760, %v3780_v8 }
 0x1f2   : > { %v2021_v58 = vsub.f32 %v1952_v56, %v1955_v57  ;;  %6835 = vmatpush3.xpose.msra.mxu0 %v1955_v57  ;;  %v8164_v62 = vpop.permute.xlu0 %2864  ;;  %v3849_v10 = vsub.f32 %v3780_v8, %v3783_v9 }
 0x1f3   : > { %6839 = vmatprep.subr.mxu0 %v7805_v1  ;;  %v2866_v63 = vsel %vm1037_vm2, %v8164_v62, 0 }
 0x1f4   : > { %v2022_v59 = vand.u32 4294901760, %v2021_v58  ;;  %v2869_v2 = vand.u32 4294901760, %v2866_v63  ;;  %v3850_v11 = vand.u32 4294901760, %v3849_v10 }
 0x1f6   : > { %v2023_v60 = vsub.f32 %v2021_v58, %v2022_v59  ;;  %v2935_v3 = vsub.f32 %v2866_v63, %v2869_v2  ;;  %v3851_v12 = vsub.f32 %v3849_v10, %v3850_v11 }
 0x1f8   : > { %v2024_v61 = vand.u32 4294901760, %v2023_v60  ;;  %v2936_v4 = vand.u32 4294901760, %v2935_v3  ;;  %v3852_v13 = vand.u32 4294901760, %v3851_v12 }
 0x1fa   : > { %6837 = vmatmul.mubr.f32.vlgmr.msra.gmra.mrb[2].mxu0 %v2024_v61  ;;  %v2937_v5 = vsub.f32 %v2935_v3, %v2936_v4 }
 0x1fb   : > { %6840 = vmatpush3.xpose.msra.mxu0 %v2024_v61  ;;  %6841 = vmatprep.mubr.msk.f32.mxu0 %vm7804_vm0, %v7805_v1  ;;  %v1582_v61 = vsub.f32 %v8120_v46, %v8144_v54 }
 0x1fc   : > { %6844 = vmatprep.subr.mxu0 %v7805_v1  ;;  %v2938_v6 = vand.u32 4294901760, %v2937_v5 }
 0x202   : > { %6842 = vmatmul.mubr.f32.vlgmr.msra.gmra.mrb[2].mxu0 %v1955_v57 }
 0x203   : > { %6845 = vmatpush3.xpose.msra.mxu0 %v2021_v58  ;;  %6846 = vmatprep.mubr.msk.f32.mxu0 %vm7804_vm0, %v7805_v1 }
 0x204   : > { %6849 = vmatprep.subr.mxu0 %v7805_v1 }
 0x20a   : > { %6847 = vmatmul.mubr.f32.vlgmr.msra.gmra.mrb[2].mxu0 %v2021_v58 }
 0x20b   : > { %6850 = vmatpush3.xpose.msra.mxu0 %v1955_v57  ;;  %6851 = vmatprep.mubr.msk.f32.mxu0 %vm7804_vm0, %v7805_v1 }
 0x20c   : > { %6854 = vmatprep.subr.mxu0 %v7805_v1 }
 0x212   : > { %6852 = vmatmul.mubr.f32.vlgmr.msra.gmra.mrb[2].mxu0 %v2022_v59 }
 0x213   : > { %6855 = vmatpush3.xpose.msra.mxu0 %v2022_v59  ;;  %6856 = vmatprep.mubr.msk.f32.mxu0 %vm7804_vm0, %v7805_v1 }
 0x214   : > { %6859 = vmatprep.subr.mxu0 %v7805_v1 }
 0x21a   : > { %6857 = vmatmul.mubr.f32.vlgmr.msra.gmra.mrb[2].mxu0 %v1955_v57 }
 0x21b   : > { %6860 = vmatpush3.xpose.msra.mxu0 %v1955_v57  ;;  %6861 = vmatprep.mubr.msk.f32.mxu0 %vm7804_vm0, %v7805_v1 }
 0x21c   : > { %6894 = vmatprep.subr.mxu0 %v7805_v1 }
 0x222   : > { %6862 = vmatmul.mubr.f32.vlgmr.msra.gmra.mrb[2].mxu0 %v1955_v57 }
 0x223   : > { %6895 = vmatpush3.xpose.msra.mxu0 %v2869_v2  ;;  %6896 = vmatprep.mubr.msk.f32.mxu0 %vm7804_vm0, %v7805_v1 }
 0x224   : > { %6899 = vmatprep.subr.mxu0 %v7805_v1 }
 0x226   : > { %6897 = vmatmul.mubr.f32.vlgmr.msra.gmra.mrb[4].mxu0 %v2938_v6 }
 0x227   : > { %6900 = vmatpush3.xpose.msra.mxu0 %v2938_v6  ;;  %6901 = vmatprep.mubr.msk.f32.mxu0 %vm7804_vm0, %v7805_v1 }
 0x228   : > { %6904 = vmatprep.subr.mxu0 %v7805_v1 }
 0x22e   : > { %6902 = vmatmul.mubr.f32.vlgmr.msra.gmra.mrb[4].mxu0 %v2869_v2 }
 0x22f   : > { %6905 = vmatpush3.xpose.msra.mxu0 %v2935_v3  ;;  %6906 = vmatprep.mubr.msk.f32.mxu0 %vm7804_vm0, %v7805_v1 }
 0x230   : > { %6909 = vmatprep.subr.mxu0 %v7805_v1 }
 0x236   : > { %6907 = vmatmul.mubr.f32.vlgmr.msra.gmra.mrb[4].mxu0 %v2935_v3 }
 0x237   : > { %6910 = vmatpush3.xpose.msra.mxu0 %v2869_v2  ;;  %6911 = vmatprep.mubr.msk.f32.mxu0 %vm7804_vm0, %v7805_v1 }
 0x238   : > { %6914 = vmatprep.subr.mxu0 %v7805_v1 }
 0x23e   : > { %6912 = vmatmul.mubr.f32.vlgmr.msra.gmra.mrb[4].mxu0 %v2936_v4 }
 0x23f   : > { %6915 = vmatpush3.xpose.msra.mxu0 %v2936_v4  ;;  %6916 = vmatprep.mubr.msk.f32.mxu0 %vm7804_vm0, %v7805_v1  ;;  %v1583_v4 = vand.u32 4294901760, %v1582_v61 }
 0x240   : > { %6919 = vmatprep.subr.mxu0 %v7805_v1 }
 0x246   : > { %6917 = vmatmul.mubr.f32.vlgmr.msra.gmra.mrb[4].mxu0 %v2869_v2 }
 0x247   : > { %6920 = vmatpush3.xpose.msra.mxu0 %v2869_v2  ;;  %6921 = vmatprep.mubr.msk.f32.mxu0 %vm7804_vm0, %v7805_v1 }
 0x248   : > { %6954 = vmatprep.subr.mxu0 %v7805_v1 }
 0x24e   : > { %6922 = vmatmul.mubr.f32.vlgmr.msra.gmra.mrb[4].mxu0 %v2869_v2 }
 0x24f   : > { %6955 = vmatpush3.xpose.msra.mxu0 %v3783_v9  ;;  %6956 = vmatprep.mubr.msk.f32.mxu0 %vm7804_vm0, %v7805_v1 }
 0x250   : > { %6959 = vmatprep.subr.mxu0 %v7805_v1 }
 0x252   : > { %6957 = vmatmul.mubr.f32.vlgmr.msra.gmra.mrb[6].mxu0 %v3852_v13 }
 0x253   : > { %6960 = vmatpush3.xpose.msra.mxu0 %v3852_v13  ;;  %6961 = vmatprep.mubr.msk.f32.mxu0 %vm7804_vm0, %v7805_v1 }
 0x254   : > { %6964 = vmatprep.subr.mxu0 %v7805_v1 }
 0x25a   : > { %6962 = vmatmul.mubr.f32.vlgmr.msra.gmra.mrb[6].mxu0 %v3783_v9 }
 0x25b   : > { %6965 = vmatpush3.xpose.msra.mxu0 %v3849_v10  ;;  %6966 = vmatprep.mubr.msk.f32.mxu0 %vm7804_vm0, %v7805_v1 }
 0x25c   : > { %6969 = vmatprep.subr.mxu0 %v7805_v1 }
 0x262   : > { %6967 = vmatmul.mubr.f32.vlgmr.msra.gmra.mrb[6].mxu0 %v3849_v10 }
 0x263   : > { %6970 = vmatpush3.xpose.msra.mxu0 %v3783_v9  ;;  %6971 = vmatprep.mubr.msk.f32.mxu0 %vm7804_vm0, %v7805_v1 }
 0x264   : > { %6974 = vmatprep.subr.mxu0 %v7805_v1 }
 0x26a   : > { %6972 = vmatmul.mubr.f32.vlgmr.msra.gmra.mrb[6].mxu0 %v3850_v11 }
 0x26b   : > { %6975 = vmatpush3.xpose.msra.mxu0 %v3850_v11  ;;  %6976 = vmatprep.mubr.msk.f32.mxu0 %vm7804_vm0, %v7805_v1 }
 0x26c   : > { %6979 = vmatprep.subr.mxu0 %v7805_v1 }
 0x272   : > { %6977 = vmatmul.mubr.f32.vlgmr.msra.gmra.mrb[6].mxu0 %v3783_v9 }
 0x273   : > { %6980 = vmatpush3.xpose.msra.mxu0 %v3783_v9  ;;  %6981 = vmatprep.mubr.msk.f32.mxu0 %vm7804_vm0, %v7805_v1 }
 0x274   : > { %7296 = vmatprep.subr.bf16.mxu0 %v7803_v0 }
 0x27a   : > { %6982 = vmatmul.mubr.f32.vlgmr.msra.gmra.mrb[6].mxu0 %v3783_v9  ;;  %v1584_v9 = vsub.f32 %v1582_v61, %v1583_v4 }
 0x27b   : > { %7022 = vmatprep.mubr.msk.f32.mxu0 %vm7804_vm0, %v7805_v1 }
 0x27c   : > { %v1585_v12 = vand.u32 4294901760, %v1584_v9 }
 0x282   : > { %v1483_v16 = vpop.f32.mrb[2].mxu1 }
 0x283   : > { %v1487_v17 = vmul.f32 0.35355338, %v1483_v16  ;;  %v6803_v18 = vpop.f32.mrb[3].mxu1 }
 0x285   : > { %v1489_v19 = vadd.f32 %v1488_v15, %v1487_v17  ;;  %v2419_v17 = vand.u32 4294901760, %v8150_v55 }
 0x287   : > { %v1490_v20 = vsel %vm1037_vm2, %v1489_v19, -inf }
 0x288   : > { %1491 = vmax.xlane.f32.xlu1 %v1490_v20 }
 0x2f5   : > { %v2396_v23 = vpop.f32.mrb[2].mxu0 }
 0x2f6   : > { %v2400_v24 = vmul.f32 0.35355338, %v2396_v23  ;;  %v6863_v25 = vpop.f32.mrb[3].mxu0 }
 0x2f8   : > { %v2402_v26 = vadd.f32 %v2401_v22, %v2400_v24 }
 0x2fa   : > { %v2403_v27 = vsel %vm1037_vm2, %v2402_v26, -inf }
 0x2fb   : > { %2404 = vmax.xlane.f32.xlu0 %v2403_v27 }
 0x315   : > { %v1492_v28 = vpop.xlane.xlu1 %1491 }
 0x316   : > { %v1493_v29 = vsub.f32 %v1489_v19, %v1492_v28  ;;  %v2496_v19 = vsub.f32 %v8150_v55, %v2419_v17 }
 0x318   : > { %v1494_v30 = vmul.f32 1.442695, %v1493_v29  ;;  %v2497_v23 = vand.u32 4294901760, %v2496_v19 }
 0x31a   : > { %7619 = vpow2.f32 %v1494_v30  ;;  %v3333_v30 = vand.u32 4294901760, %v8164_v62 }
 0x321   : > { %v3310_v33 = vpop.f32.mrb[4].mxu0 }
 0x322   : > { %v3314_v34 = vmul.f32 0.35355338, %v3310_v33  ;;  %v6923_v35 = vpop.f32.mrb[5].mxu0 }
 0x324   : > { %v7620_v36 = vpop.eup %7619  ;;  %v3316_v37 = vadd.f32 %v3315_v32, %v3314_v34  ;;  %v3410_v32 = vsub.f32 %v8164_v62, %v3333_v30 }
 0x325   : > { %v1496_v38 = vsel %vm1037_vm2, %v7620_v36, 0.0 }
 0x326   : > { %1497 = vadd.xlane.f32.xlu0 %v1496_v38  ;;  %v3317_v39 = vsel %vm1037_vm2, %v3316_v37, -inf }
 0x327   : > { %3318 = vmax.xlane.f32.xlu1 %v3317_v39 }
 0x34d   : > { %v4224_v42 = vpop.f32.mrb[6].mxu0 }
 0x34e   : > { %v4228_v43 = vmul.f32 0.35355338, %v4224_v42  ;;  %v6983_v44 = vpop.f32.mrb[7].mxu0 }
 0x350   : > { %v4230_v45 = vadd.f32 %v4229_v41, %v4228_v43  ;;  %v4247_v43 = vand.u32 4294901760, %v8186_v7 }
 0x352   : > { %v4231_v47 = vsel %vm1037_vm2, %v4230_v45, -inf }
 0x353   : > { %4232 = vmax.xlane.f32.xlu1 %v4231_v47 }
 0x388   : > { %v2405_v48 = vpop.xlane.xlu0 %2404 }
 0x389   : > { %v2406_v49 = vsub.f32 %v2402_v26, %v2405_v48  ;;  %v2498_v26 = vsub.f32 %v2496_v19, %v2497_v23 }
 0x38b   : > { %v2407_v50 = vmul.f32 1.442695, %v2406_v49  ;;  %v2499_v29 = vand.u32 4294901760, %v2498_v26 }
 0x38d   : > { %7621 = vpow2.f32 %v2407_v50 }
 0x397   : > { %v7622_v51 = vpop.eup %7621 }
 0x398   : > { %v2409_v52 = vsel %vm1037_vm2, %v7622_v51, 0.0 }
 0x399   : > { %2410 = vadd.xlane.f32.xlu0 %v2409_v52 }
 0x3b3   : > { %v1498_v53 = vpop.xlane.xlu0 %1497 }
 0x3b4   : > { %7623 = vrcp.f32 %v1498_v53  ;;  %v3319_v56 = vpop.xlane.xlu1 %3318 }
 0x3b5   : > { %v3320_v57 = vsub.f32 %v3316_v37, %v3319_v56 }
 0x3b7   : > { %v3321_v58 = vmul.f32 1.442695, %v3320_v57 }
 0x3b9   : > { %7625 = vpow2.f32 %v3321_v58 }
 0x3be   : > { %v7624_v59 = vpop.eup %7623 }
 0x3bf   : > { %v1500_v60 = vmul.f32 %v7624_v59, %v7620_v36  ;;  %v3411_v36 = vand.u32 4294901760, %v3410_v32 }
 0x3c1   : > { %v1502_v63 = vsel %vm1037_vm2, %v1500_v60, 0  ;;  %v3412_v39 = vsub.f32 %v3410_v32, %v3411_v36 }
 0x3c2   : > { %v1570_v2 = vand.u32 4294901760, %v1502_v63 }
 0x3c3   : > { %v8236_v3 = vpop.eup %7625  ;;  %v3413_v41 = vand.u32 4294901760, %v3412_v39 }
 0x3c4   : > { %v3323_v5 = vsel %vm1037_vm2, %v8236_v3, 0.0  ;;  %v1571_v6 = vsub.f32 %v1502_v63, %v1570_v2  ;;  %v4709_v63 = vld [vmem:[#allocation5] sm:$0xff] }
 0x3c5   : > { %3324 = vadd.xlane.f32.xlu0 %v3323_v5 }
 0x3c6   : > { %v1572_v8 = vand.u32 4294901760, %v1571_v6 }
 0x3c8   : > { %v1573_v10 = vsub.f32 %v1571_v6, %v1572_v8 }
 0x3ca   : > { %v1574_v11 = vand.u32 4294901760, %v1573_v10 }
 0x3cc   : > { %6807 = vmatmul.mubr.f32.vlgmr.msra.gmra.mrb[4].mxu1 %v1574_v11 }
 0x3cd   : > { %6810 = vmatpush3.msra.mxu1 %v1585_v12  ;;  %6811 = vmatprep.mubr.msk.f32.mxu1 %vm7804_vm0, %v7805_v1 }
 0x3ce   : > { %6814 = vmatprep.subr.mxu1 %v7805_v1 }
 0x3d4   : > { %6812 = vmatmul.mubr.f32.vlgmr.msra.gmra.mrb[4].mxu1 %v1570_v2 }
 0x3d5   : > { %6815 = vmatpush3.msra.mxu1 %v1582_v61  ;;  %6816 = vmatprep.mubr.msk.f32.mxu1 %vm7804_vm0, %v7805_v1 }
 0x3d6   : > { %6819 = vmatprep.subr.mxu1 %v7805_v1 }
 0x3dc   : > { %6817 = vmatmul.mubr.f32.vlgmr.msra.gmra.mrb[4].mxu1 %v1571_v6 }
 0x3dd   : > { %6820 = vmatpush3.msra.mxu1 %v8144_v54  ;;  %6821 = vmatprep.mubr.msk.f32.mxu1 %vm7804_vm0, %v7805_v1 }
 0x3de   : > { %6824 = vmatprep.subr.mxu1 %v7805_v1 }
 0x3e0   : > { %v4233_v46 = vpop.xlane.xlu1 %4232 }
 0x3e1   : > { %v4234_v13 = vsub.f32 %v4230_v45, %v4233_v46  ;;  %v4324_v45 = vsub.f32 %v8186_v7, %v4247_v43 }
 0x3e3   : > { %v4235_v14 = vmul.f32 1.442695, %v4234_v13  ;;  %v4325_v50 = vand.u32 4294901760, %v4324_v45 }
 0x3e4   : > { %6822 = vmatmul.mubr.f32.vlgmr.msra.gmra.mrb[4].mxu1 %v1572_v8 }
 0x3e5   : > { %7627 = vpow2.f32 %v4235_v14  ;;  %6825 = vmatpush3.msra.mxu1 %v1583_v4  ;;  %6826 = vmatprep.mubr.msk.f32.mxu1 %vm7804_vm0, %v7805_v1  ;;  %v4326_v53 = vsub.f32 %v4324_v45, %v4325_v50 }
 0x3e6   : > { %6829 = vmatprep.subr.mxu1 %v7805_v1 }
 0x3e7   : > { %v4327_v57 = vand.u32 4294901760, %v4326_v53 }
 0x3ec   : > { %6827 = vmatmul.mubr.f32.vlgmr.msra.gmra.mrb[4].mxu1 %v1570_v2 }
 0x3ed   : > { %6830 = vmatpush3.msra.mxu1 %v8144_v54  ;;  %6831 = vmatprep.mubr.msk.f32.mxu1 %vm7804_vm0, %v7805_v1 }
 0x3ee   : > { %6864 = vmatprep.subr.mxu1 %v7805_v1 }
 0x3ef   : > { %v8257_v15 = vpop.eup %7627 }
 0x3f0   : > { %v4237_v16 = vsel %vm1037_vm2, %v8257_v15, 0.0 }
 0x3f1   : > { %4238 = vadd.xlane.f32.xlu1 %v4237_v16  ;;  %v4711_v16 = vld [vmem:[#allocation5 + $0x10] sm:$0xff] }
 0x3f4   : > { %6832 = vmatmul.mubr.f32.vlgmr.msra.gmra.mrb[4].mxu1 %v1570_v2  ;;  %v4710_v2 = vld [vmem:[#allocation5 + $0x8] sm:$0xff] }
 0x3f5   : > { %6865 = vmatpush3.msra.mxu1 %v2419_v17  ;;  %6866 = vmatprep.mubr.msk.f32.mxu1 %vm7804_vm0, %v7805_v1  ;;  %v4727_v4 = vand.u32 4294901760, %v4710_v2 }
 0x3f6   : > { %6869 = vmatprep.subr.mxu1 %v7805_v1 }
 0x3f7   : > { %v8330_v6 = vsub.f32 %v4710_v2, %v4727_v4 }
 0x3f9   : > { %v4812_v9 = vand.u32 4294901760, %v8330_v6 }
 0x3fb   : > { %v4813_v11 = vsub.f32 %v8330_v6, %v4812_v9 }
 0x3fd   : > { %v4814_v46 = vand.u32 4294901760, %v4813_v11 }
 0x426   : > { %v2411_v54 = vpop.xlane.xlu0 %2410 }
 0x427   : > { %7629 = vrcp.f32 %v2411_v54  ;;  %v4730_v54 = vand.u32 4294901760, %v4711_v16 }
 0x431   : > { %v7630_v18 = vpop.eup %7629 }
 0x432   : > { %v2413_v20 = vmul.f32 %v7630_v18, %v7622_v51 }
 0x434   : > { %v2416_v21 = vsel %vm1037_vm2, %v2413_v20, 0 }
 0x435   : > { %v2484_v22 = vand.u32 4294901760, %v2416_v21 }
 0x437   : > { %v2485_v24 = vsub.f32 %v2416_v21, %v2484_v22 }
 0x439   : > { %v2486_v25 = vand.u32 4294901760, %v2485_v24 }
 0x43b   : > { %v2487_v27 = vsub.f32 %v2485_v24, %v2486_v25 }
 0x43d   : > { %v2488_v28 = vand.u32 4294901760, %v2487_v27 }
 0x43f   : > { %6867 = vmatmul.mubr.f32.vlgmr.msra.gmra.mrb[6].mxu1 %v2488_v28 }
 0x440   : > { %6870 = vmatpush3.msra.mxu1 %v2499_v29  ;;  %6871 = vmatprep.mubr.msk.f32.mxu1 %vm7804_vm0, %v7805_v1 }
 0x441   : > { %6874 = vmatprep.subr.mxu1 %v7805_v1 }
 0x447   : > { %6872 = vmatmul.mubr.f32.vlgmr.msra.gmra.mrb[6].mxu1 %v2484_v22 }
 0x448   : > { %6875 = vmatpush3.msra.mxu1 %v2496_v19  ;;  %6876 = vmatprep.mubr.msk.f32.mxu1 %vm7804_vm0, %v7805_v1  ;;  %v4818_v19 = vsub.f32 %v4711_v16, %v4730_v54  ;;  %v5241_v16 = vld [vmem:[#allocation7 + $0x10] sm:$0xff] }
 0x449   : > { %6879 = vmatprep.subr.mxu1 %v7805_v1 }
 0x44a   : > { %v4819_v21 = vand.u32 4294901760, %v4818_v19 }
 0x44f   : > { %6877 = vmatmul.mubr.f32.vlgmr.msra.gmra.mrb[6].mxu1 %v2485_v24 }
 0x450   : > { %6880 = vmatpush3.msra.mxu1 %v2419_v17  ;;  %6881 = vmatprep.mubr.msk.f32.mxu1 %vm7804_vm0, %v7805_v1 }
 0x451   : > { %6884 = vmatprep.subr.mxu1 %v7805_v1 }
 0x452   : > { %v3325_v55 = vpop.xlane.xlu0 %3324 }
 0x453   : > { %7631 = vrcp.f32 %v3325_v55 }
 0x457   : > { %6882 = vmatmul.mubr.f32.vlgmr.msra.gmra.mrb[6].mxu1 %v2486_v25 }
 0x458   : > { %6885 = vmatpush3.msra.mxu1 %v2497_v23  ;;  %6886 = vmatprep.mubr.msk.f32.mxu1 %vm7804_vm0, %v7805_v1  ;;  %v4820_v23 = vsub.f32 %v4818_v19, %v4819_v21 }
 0x459   : > { %6889 = vmatprep.subr.mxu1 %v7805_v1 }
 0x45a   : > { %v4821_v25 = vand.u32 4294901760, %v4820_v23 }
 0x45d   : > { %v7632_v31 = vpop.eup %7631 }
 0x45e   : > { %v3327_v33 = vmul.f32 %v7632_v31, %v8236_v3  ;;  %v4724_v3 = vand.u32 4294901760, %v4709_v63 }
 0x45f   : > { %6887 = vmatmul.mubr.f32.vlgmr.msra.gmra.mrb[6].mxu1 %v2484_v22 }
 0x460   : > { %6890 = vmatpush3.msra.mxu1 %v2419_v17  ;;  %6891 = vmatprep.mubr.msk.f32.mxu1 %vm7804_vm0, %v7805_v1  ;;  %v3330_v34 = vsel %vm1037_vm2, %v3327_v33, 0  ;;  %v8328_v5 = vsub.f32 %v4709_v63, %v4724_v3  ;;  %v4712_v17 = vld [vmem:[#allocation5 + $0x18] sm:$0xff]  ;;  %v7297_v28 = vpack.c.bf16 %v4727_v4, %v4724_v3 }
 0x461   : > { %6924 = vmatprep.subr.mxu1 %v7805_v1  ;;  %v3398_v35 = vand.u32 4294901760, %v3330_v34  ;;  %v4733_v18 = vand.u32 4294901760, %v4712_v17 }
 0x462   : > { %v4805_v8 = vand.u32 4294901760, %v8328_v5  ;;  %7298 = vmatpush3.bf16.msra.mxu0 %v7297_v28  ;;  %v7309_v55 = vpack.c.bf16 %v8330_v6, %v8328_v5  ;;  %v7639_v6 = vld [vmem:[%s8063_s18] sm:$0xff]  ;;  %s6340_s18 = sshll.u32 %s526_s25, 4  ;;  %s8551_s18 = int_to_ptr.vmem [resolvable:$true] %s6340_s18 }
 0x463   : > { %v3399_v37 = vsub.f32 %v3330_v34, %v3398_v35  ;;  %v4825_v20 = vsub.f32 %v4712_v17, %v4733_v18  ;;  %7299 = vmatprep.subr.bf16.mxu0 %v7803_v0  ;;  %v7300_v29 = vpack.c.bf16 %v4733_v18, %v4730_v54  ;;  %v5242_v18 = vld [vmem:[#allocation7 + $0x18] sm:$0xff]  ;;  %s7726_s26 = scalar_lea.vmem %s8551_s18, 128  ;;  %p7733_p9 = scmp.lt.s32.totalorder %s8551_s18, %s7731_s14 }
 0x464   : > { %v4806_v10 = vsub.f32 %v8328_v5, %v4805_v8  ;;  %v7321_v33 = vpack.c.bf16 %v4812_v9, %v4805_v8  ;;  %p7727_p0 = scmp.ne.s32.totalorder %s8551_s18, %s7726_s26 }
 0x465   : > { %v3400_v38 = vand.u32 4294901760, %v3399_v37 }
 0x466   : > { %v4807_v12 = vand.u32 4294901760, %v4806_v10  ;;  %7301 = vmatpush3.bf16.msra.mxu0 %v7300_v29  ;;  %p7728_p3 = pnand %p7727_p0, %p8639_p1 }
 0x467   : > { %6892 = vmatmul.mubr.f32.vlgmr.msra.gmra.mrb[6].mxu1 %v2484_v22  ;;  %v3401_v40 = vsub.f32 %v3399_v37, %v3400_v38  ;;  %v4826_v22 = vand.u32 4294901760, %v4825_v20  ;;  %7308 = vmatprep.subr.bf16.mxu0 %v7803_v0 }
 0x468   : > { %6925 = vmatpush3.msra.mxu1 %v3333_v30  ;;  %6926 = vmatprep.mubr.msk.f32.mxu1 %vm7804_vm0, %v7805_v1  ;;  %v7303_v13 = vpack.c.bf16 %v4814_v46, %v4807_v12  ;;  %p7729_p7 = pneg %p7728_p3 }
 0x469   : > { %6929 = vmatprep.subr.mxu1 %v7805_v1  ;;  %v3402_v62 = vand.u32 4294901760, %v3401_v40  ;;  %v4827_v24 = vsub.f32 %v4825_v20, %v4826_v22  ;;  %v7324_v34 = vpack.c.bf16 %v4826_v22, %v4819_v21 }
 0x46b   : > { %6927 = vmatmul.mubr.f32.vlgmr.msra.gmra.mrb[8].mxu1 %v3402_v62  ;;  %v4828_v26 = vand.u32 4294901760, %v4827_v24 }
 0x46c   : > { %6930 = vmatpush3.msra.mxu1 %v3413_v41  ;;  %6931 = vmatprep.mubr.msk.f32.mxu1 %vm7804_vm0, %v7805_v1 }
 0x46d   : > { %6934 = vmatprep.subr.mxu1 %v7805_v1  ;;  %v7306_v27 = vpack.c.bf16 %v4828_v26, %v4821_v25 }
 0x473   : > { %6932 = vmatmul.mubr.f32.vlgmr.msra.gmra.mrb[8].mxu1 %v3398_v35 }
 0x474   : > { %6935 = vmatpush3.msra.mxu1 %v3410_v32  ;;  %6936 = vmatprep.mubr.msk.f32.mxu1 %vm7804_vm0, %v7805_v1  ;;  %v7312_v32 = vpack.c.bf16 %v4825_v20, %v4818_v19  ;;  %v5260_v19 = vand.u32 4294901760, %v5241_v16  ;;  %v5263_v20 = vand.u32 4294901760, %v5242_v18 }
 0x475   : > { %6939 = vmatprep.subr.mxu1 %v7805_v1 }
 0x476   : > { %v5348_v24 = vsub.f32 %v5241_v16, %v5260_v19  ;;  %v5355_v25 = vsub.f32 %v5242_v18, %v5263_v20  ;;  %v8373_v26 = vpack.c.bf16 %v5263_v20, %v5260_v19  ;;  %v5745_v16 = vld [vmem:[%s8602_s8 + $0x30] sm:$0xff] }
 0x47b   : > { %6937 = vmatmul.mubr.f32.vlgmr.msra.gmra.mrb[8].mxu1 %v3399_v37 }
 0x47c   : > { %6940 = vmatpush3.msra.mxu1 %v3333_v30  ;;  %6941 = vmatprep.mubr.msk.f32.mxu1 %vm7804_vm0, %v7805_v1 }
 0x47d   : > { %6944 = vmatprep.subr.mxu1 %v7805_v1 }
 0x47e   : > { %v4239_v42 = vpop.xlane.xlu1 %4238 }
 0x47f   : > { %7633 = vrcp.f32 %v4239_v42 }
 0x483   : > { %6942 = vmatmul.mubr.f32.vlgmr.msra.gmra.mrb[8].mxu1 %v3400_v38 }
 0x484   : > { %6945 = vmatpush3.msra.mxu1 %v3411_v36  ;;  %6946 = vmatprep.mubr.msk.f32.mxu1 %vm7804_vm0, %v7805_v1 }
 0x485   : > { %6949 = vmatprep.subr.mxu1 %v7805_v1 }
 0x489   : > { %v7634_v44 = vpop.eup %7633 }
 0x48a   : > { %v4241_v47 = vmul.f32 %v7634_v44, %v8257_v15 }
 0x48b   : > { %6947 = vmatmul.mubr.f32.vlgmr.msra.gmra.mrb[8].mxu1 %v3398_v35 }
 0x48c   : > { %6950 = vmatpush3.msra.mxu1 %v3333_v30  ;;  %6951 = vmatprep.mubr.msk.f32.mxu1 %vm7804_vm0, %v7805_v1  ;;  %v4244_v48 = vsel %vm1037_vm2, %v4241_v47, 0 }
 0x48d   : > { %6984 = vmatprep.subr.mxu1 %v7805_v1  ;;  %v4312_v49 = vand.u32 4294901760, %v4244_v48 }
 0x48f   : > { %v4313_v51 = vsub.f32 %v4244_v48, %v4312_v49 }
 0x491   : > { %v4314_v52 = vand.u32 4294901760, %v4313_v51 }
 0x493   : > { %6952 = vmatmul.mubr.f32.vlgmr.msra.gmra.mrb[8].mxu1 %v3398_v35  ;;  %v4315_v56 = vsub.f32 %v4313_v51, %v4314_v52 }
 0x494   : > { %6985 = vmatpush3.msra.mxu1 %v4247_v43  ;;  %6986 = vmatprep.mubr.msk.f32.mxu1 %vm7804_vm0, %v7805_v1 }
 0x495   : > { %6989 = vmatprep.subr.mxu1 %v7805_v1  ;;  %v4316_v7 = vand.u32 4294901760, %v4315_v56 }
 0x497   : > { %6987 = vmatmul.mubr.f32.vlgmr.msra.gmra.mrb[10].mxu1 %v4316_v7 }
 0x498   : > { %6990 = vmatpush3.msra.mxu1 %v4327_v57  ;;  %6991 = vmatprep.mubr.msk.f32.mxu1 %vm7804_vm0, %v7805_v1 }
 0x499   : > { %6994 = vmatprep.subr.mxu1 %v7805_v1 }
 0x49f   : > { %6992 = vmatmul.mubr.f32.vlgmr.msra.gmra.mrb[10].mxu1 %v4312_v49 }
 0x4a0   : > { %6995 = vmatpush3.msra.mxu1 %v4324_v45  ;;  %6996 = vmatprep.mubr.msk.f32.mxu1 %vm7804_vm0, %v7805_v1 }
 0x4a1   : > { %6999 = vmatprep.subr.mxu1 %v7805_v1 }
 0x4a7   : > { %6997 = vmatmul.mubr.f32.vlgmr.msra.gmra.mrb[10].mxu1 %v4313_v51 }
 0x4a8   : > { %7000 = vmatpush3.msra.mxu1 %v4247_v43  ;;  %7001 = vmatprep.mubr.msk.f32.mxu1 %vm7804_vm0, %v7805_v1 }
 0x4a9   : > { %7004 = vmatprep.subr.mxu1 %v7805_v1 }
 0x4af   : > { %7002 = vmatmul.mubr.f32.vlgmr.msra.gmra.mrb[10].mxu1 %v4314_v52 }
 0x4b0   : > { %7005 = vmatpush3.msra.mxu1 %v4325_v50  ;;  %7006 = vmatprep.mubr.msk.f32.mxu1 %vm7804_vm0, %v7805_v1 }
 0x4b1   : > { %7009 = vmatprep.subr.mxu1 %v7805_v1 }
 0x4b7   : > { %7007 = vmatmul.mubr.f32.vlgmr.msra.gmra.mrb[10].mxu1 %v4312_v49 }
 0x4b8   : > { %7010 = vmatpush3.msra.mxu1 %v4247_v43  ;;  %7011 = vmatprep.mubr.msk.f32.mxu1 %vm7804_vm0, %v7805_v1 }
 0x4b9   : > { %7302 = vmatprep.subr.bf16.mxu1 %v7803_v0 }
 0x4bf   : > { %7012 = vmatmul.mubr.f32.vlgmr.msra.gmra.mrb[10].mxu1 %v4312_v49  ;;  %v6456_v49 = vld [vmem:[%s8599_s5] ss:$0 sm:$0xff] }
 0x4c0   : > { %7033 = vmatprep.mubr.msk.f32.mxu1 %vm7804_vm0, %v7805_v1  ;;  %7304 = vmatpush3.bf16.msra.mxu1 %v7303_v13 }
 0x4c1   : > { %7305 = vmatprep.subr.bf16.mxu1 %v7803_v0 }
 0x4c4   : > { %7307 = vmatpush3.bf16.msra.mxu1 %v7306_v27 }
 0x4c5   : > { %7314 = vmatprep.subr.bf16.mxu1 %v7803_v0 }
 0x4c7   : > { %v1946_v58 = vpop.f32.mrb[4].mxu1 }
 0x4c8   : > { %v6833_v59 = vpop.f32.mrb[5].mxu1 }
 0x53a   : > { %v2860_v60 = vpop.f32.mrb[6].mxu1 }
 0x53b   : > { %4693 = vrot.lane.b32.xlu0 %v2860_v60, %s7809_s29  ;;  %v6893_v61 = vpop.f32.mrb[7].mxu1 }
 0x566   : > { %v3774_v14 = vpop.f32.mrb[8].mxu1 }
 0x567   : > { %4697 = vrot.lane.b32.xlu1 %v3774_v14, %s7810_s23  ;;  %v6953_v15 = vpop.f32.mrb[9].mxu1  ;;  %v5239_v14 = vld [vmem:[#allocation7] sm:$0xff] }
 0x568   : > { %v5240_v15 = vld [vmem:[#allocation7 + $0x8] sm:$0xff]  ;;  %v5254_v17 = vand.u32 4294901760, %v5239_v14 }
 0x569   : > { %v5257_v54 = vand.u32 4294901760, %v5240_v15 }
 0x56a   : > { %v5334_v22 = vsub.f32 %v5239_v14, %v5254_v17 }
 0x56b   : > { %v8370_v21 = vpack.c.bf16 %v5257_v54, %v5254_v17  ;;  %v5341_v23 = vsub.f32 %v5240_v15, %v5257_v54  ;;  %v5746_v17 = vld [vmem:[%s8602_s8 + $0x38] sm:$0xff]  ;;  %v5777_v54 = vand.u32 4294901760, %v5745_v16 }
 0x56c   : > { %v5335_v27 = vand.u32 4294901760, %v5334_v22  ;;  %v5780_v18 = vand.u32 4294901760, %v5746_v17 }
 0x56e   : > { %v8460_v19 = vpack.c.bf16 %v5780_v18, %v5777_v54 }
 0x592   : > { %v4688_v30 = vpop.f32.mrb[10].mxu1 }
 0x593   : > { %4701 = vrot.lane.b32.xlu1 %v4688_v30, %s7811_s19  ;;  %v7013_v31 = vpop.f32.mrb[11].mxu1  ;;  %s8637_s19 = sld [smem:[#allocation18_spill]] }
 0x5ad   : > { %v4694_v35 = vpop.permute.xlu0 %4693 }
 0x5ae   : > { %v4704_v37 = vsel %vm1037_vm2, %v1946_v58, %v4694_v35 }
 0x5d9   : > { %v4698_v36 = vpop.permute.xlu1 %4697 }
 0x5da   : > { %v4706_v38 = vsel %vm4705_vm3, %v4704_v37, %v4698_v36 }
 0x605   : > { %v4702_v39 = vpop.permute.xlu1 %4701 }
 0x606   : > { %v4708_v40 = vsel %vm4707_vm4, %v4706_v38, %v4702_v39 }
 0x607   : > { %v4721_v62 = vsel %vm548_vm1, %v4708_v40, 0  ;;  %v7345_v40 = vpack.c.bf16 %v5341_v23, %v5334_v22 }
 0x608   : > { %v4792_v41 = vand.u32 4294901760, %v4721_v62 }
 0x60a   : > { %v4793_v42 = vsub.f32 %v4721_v62, %v4792_v41  ;;  %7034 = vmatmul.mubr.f32.vlgmr.msra.gmra.mrb[12].mxu1 %v4792_v41  ;;  %v7348_v62 = vpack.c.bf16 %v5355_v25, %v5348_v24 }
 0x60b   : > { %7316 = vmatpush3.bf16.msra.mxu1 %v7297_v28  ;;  %7055 = vmatprep.mubr.msk.f32.mxu1 %vm7804_vm0, %v7805_v1 }
 0x60c   : > { %7317 = vmatprep.subr.bf16.mxu1 %v7803_v0  ;;  %v4794_v43 = vand.u32 4294901760, %v4793_v42 }
 0x60e   : > { %v4795_v44 = vsub.f32 %v4793_v42, %v4794_v43 }
 0x60f   : > { %7319 = vmatpush3.bf16.msra.mxu1 %v7300_v29 }
 0x610   : > { %7326 = vmatprep.subr.bf16.mxu1 %v7803_v0  ;;  %v4796_v45 = vand.u32 4294901760, %v4795_v44  ;;  %v5740_v44 = vld [vmem:[%s8602_s8 + $0x8] sm:$0xff] }
 0x612   : > { %7056 = vmatmul.mubr.f32.vlgmr.msra.gmra.mrb[14].mxu1 %v4794_v43  ;;  %7023 = vmatmul.mubr.f32.vlgmr.msra.gmra.mrb[8].mxu0 %v4796_v45  ;;  %v5739_v43 = vld [vmem:[%s8602_s8] sm:$0xff] }
 0x613   : > { %7310 = vmatpush3.bf16.msra.mxu0 %v7309_v55  ;;  %7328 = vmatpush3.bf16.msra.mxu1 %v7297_v28  ;;  %v5342_v28 = vand.u32 4294901760, %v5341_v23  ;;  %v5759_v45 = vand.u32 4294901760, %v5739_v43 }
 0x614   : > { %7311 = vmatprep.subr.bf16.mxu0 %v7803_v0  ;;  %7329 = vmatprep.subr.bf16.mxu1 %v7803_v0 }
 0x615   : > { %7044 = vmatprep.mubr.msk.f32.mxu0 %vm7804_vm0, %v7805_v1  ;;  %7077 = vmatprep.mubr.msk.f32.mxu1 %vm7804_vm0, %v7805_v1  ;;  %v5343_v55 = vsub.f32 %v5341_v23, %v5342_v28 }
 0x617   : > { %7313 = vmatpush3.bf16.msra.mxu0 %v7312_v32  ;;  %7331 = vmatpush3.bf16.msra.mxu1 %v7300_v29  ;;  %v5336_v29 = vsub.f32 %v5334_v22, %v5335_v27  ;;  %v5344_v31 = vand.u32 4294901760, %v5343_v55  ;;  %v5349_v32 = vand.u32 4294901760, %v5348_v24 }
 0x618   : > { %7320 = vmatprep.subr.bf16.mxu0 %v7803_v0  ;;  %7368 = vmatprep.subr.bf16.mxu1 %v7803_v0 }
 0x619   : > { %v5337_v30 = vand.u32 4294901760, %v5336_v29  ;;  %v5350_v35 = vsub.f32 %v5348_v24, %v5349_v32  ;;  %v8471_v24 = vsub.f32 %v5745_v16, %v5777_v54 }
 0x61a   : > { %7045 = vmatmul.mubr.f32.vlgmr.msra.gmra.mrb[10].mxu0 %v4793_v42  ;;  %7078 = vmatmul.mubr.f32.vlgmr.msra.gmra.mrb[16].mxu1 %v4792_v41 }
 0x61b   : > { %7322 = vmatpush3.bf16.msra.mxu0 %v7321_v33  ;;  %7066 = vmatprep.mubr.msk.f32.mxu0 %vm7804_vm0, %v7805_v1  ;;  %v5356_v33 = vand.u32 4294901760, %v5355_v25  ;;  %v5351_v37 = vand.u32 4294901760, %v5350_v35 }
 0x61c   : > { %7323 = vmatprep.subr.bf16.mxu0 %v7803_v0  ;;  %7162 = vmatprep.mubr.msk.f32.mxu1 %vm7804_vm0, %v7805_v1 }
 0x61d   : > { %v5357_v36 = vsub.f32 %v5355_v25, %v5356_v33  ;;  %v7360_v42 = vpack.c.bf16 %v5356_v33, %v5349_v32  ;;  %v8473_v25 = vsub.f32 %v5746_v17, %v5780_v18  ;;  %v6460_v17 = vld [vmem:[%s8635_s12] ss:$0 sm:$0xff] }
 0x61f   : > { %7325 = vmatpush3.bf16.msra.mxu0 %v7324_v34  ;;  %v7339_v34 = vpack.c.bf16 %v5344_v31, %v5337_v30  ;;  %v5358_v38 = vand.u32 4294901760, %v5357_v36 }
 0x620   : > { %7332 = vmatprep.subr.bf16.mxu0 %v7803_v0 }
 0x621   : > { %v7342_v39 = vpack.c.bf16 %v5358_v38, %v5351_v37 }
 0x622   : > { %7067 = vmatmul.mubr.f32.vlgmr.msra.gmra.mrb[12].mxu0 %v4792_v41  ;;  %v7357_v41 = vpack.c.bf16 %v5342_v28, %v5335_v27 }
 0x623   : > { %7088 = vmatprep.mubr.msk.f32.mxu0 %vm7804_vm0, %v7805_v1  ;;  %7334 = vmatpush3.bf16.msra.mxu0 %v8370_v21 }
 0x624   : > { %7335 = vmatprep.subr.bf16.mxu0 %v7803_v0 }
 0x627   : > { %7337 = vmatpush3.bf16.msra.mxu0 %v8373_v26 }
 0x628   : > { %7338 = vmatprep.subr.bf16.mxu0 %v7803_v0 }
 0x6dd   : > { %v4889_v47 = vpop.f32.mrb[12].mxu1 }
 0x6de   : > { %v7035_v48 = vpop.f32.mrb[13].mxu1 }
 0x6e5   : > { %v5046_v50 = vpop.f32.mrb[14].mxu1  ;;  %v4798_v51 = vpop.f32.mrb[8].mxu0 }
 0x6e6   : > { %v4799_v52 = vadd.f32 %v6456_v49, %v4798_v51  ;;  %v7057_v53 = vpop.f32.mrb[15].mxu1  ;;  %v7024_v56 = vpop.f32.mrb[9].mxu0  ;;  %v8386_v49 = vsub.f32 %v5739_v43, %v5759_v45 }
 0x6e8   : > { %v4890_v7 = vadd.f32 %v4889_v47, %v4799_v52  ;;  %v5762_v47 = vand.u32 4294901760, %v5740_v44 }
 0x6ea   : > { %v8384_v48 = vpack.c.bf16 %v5762_v47, %v5759_v45  ;;  %v5893_v45 = vand.u32 4294901760, %v8473_v25 }
 0x6ec   : > { %7370 = vmatpush3.bf16.msra.mxu1 %v8384_v48 }
 0x6ed   : > { %v4969_v57 = vpop.f32.mrb[10].mxu0  ;;  %v5204_v58 = vpop.f32.mrb[16].mxu1  ;;  %7371 = vmatprep.subr.bf16.mxu1 %v7803_v0 }
 0x6ee   : > { %v4970_v59 = vadd.f32 %v4969_v57, %v4890_v7  ;;  %v7046_v60 = vpop.f32.mrb[11].mxu0  ;;  %v7079_v61 = vpop.f32.mrb[17].mxu1  ;;  %v6457_v7 = vld [vmem:[%s8604_s10] ss:$0 sm:$0xff] }
 0x6f0   : > { %v5047_v63 = vadd.f32 %v5046_v50, %v4970_v59  ;;  %v8388_v50 = vsub.f32 %v5740_v44, %v5762_v47  ;;  %v5886_v44 = vand.u32 4294901760, %v8471_v24 }
 0x6f2   : > { %v5851_v27 = vand.u32 4294901760, %v8388_v50 }
 0x6f4   : > { %v5852_v29 = vsub.f32 %v8388_v50, %v5851_v27 }
 0x6f5   : > { %v5129_v2 = vpop.f32.mrb[12].mxu0 }
 0x6f6   : > { %v5130_v3 = vadd.f32 %v5129_v2, %v5047_v63  ;;  %v7068_v4 = vpop.f32.mrb[13].mxu0  ;;  %v5853_v30 = vand.u32 4294901760, %v5852_v29 }
 0x6f8   : > { %v5205_v5 = vadd.f32 %v5204_v58, %v5130_v3  ;;  %v6458_v58 = vld [vmem:[%s8605_s11] ss:$0 sm:$0xff] }
 0x6fa   : > { %v5208_v8 = vadd.f32 %v7639_v6, %v5205_v5  ;;  %v5741_v6 = vld [vmem:[%s8602_s8 + $0x10] sm:$0xff] }
 0x6fc   : > { %v5211_v9 = vsel %vm548_vm1, %v5208_v8, 0.0 }
 0x6fd   : > { %5212 = vadd.xlane.f32.xlu0 %v5211_v9  ;;  %v5765_v9 = vand.u32 4294901760, %v5741_v6 }
 0x6ff   : > { %v8462_v20 = vsub.f32 %v5741_v6, %v5765_v9 }
 0x701   : > { %v5858_v31 = vand.u32 4294901760, %v8462_v20 }
 0x78a   : > { %v5213_v10 = vpop.xlane.xlu0 %5212 }
 0x78b   : > { %v5215_v11 = vmul.f32 0.03125, %v5213_v10 }
 0x78d   : > { %v5216_v12 = vsub.f32 %v5208_v8, %v5215_v11  ;;  %v5742_v8 = vld [vmem:[%s8602_s8 + $0x18] sm:$0xff] }
 0x78e   : > { %v5768_v10 = vand.u32 4294901760, %v5742_v8 }
 0x78f   : > { %v5217_v46 = vmul.f32 %v5216_v12, %v5216_v12 }
 0x790   : > { %v8436_v11 = vpack.c.bf16 %v5768_v10, %v5765_v9 }
 0x791   : > { %v5218_v13 = vsel %vm548_vm1, %v5217_v46, 0.0  ;;  %v5744_v46 = vld [vmem:[%s8602_s8 + $0x28] sm:$0xff] }
 0x792   : > { %5219 = vadd.xlane.f32.xlu1 %v5218_v13  ;;  %7373 = vmatpush3.bf16.msra.mxu1 %v8436_v11  ;;  %v5774_v14 = vand.u32 4294901760, %v5744_v46 }
 0x793   : > { %7374 = vmatprep.subr.bf16.mxu1 %v7803_v0 }
 0x794   : > { %v8468_v23 = vsub.f32 %v5744_v46, %v5774_v14 }
 0x81f   : > { %v5220_v51 = vpop.xlane.xlu1 %5219 }
 0x820   : > { %v5221_v52 = vmul.f32 0.03125, %v5220_v51  ;;  %v5887_v51 = vsub.f32 %v8471_v24, %v5886_v44 }
 0x822   : > { %v5222_v53 = vadd.f32 1e-05, %v5221_v52  ;;  %v5894_v52 = vsub.f32 %v8473_v25, %v5893_v45 }
 0x824   : > { %7635 = vrsqrt.f32 %v5222_v53  ;;  %v5888_v53 = vand.u32 4294901760, %v5887_v51 }
 0x82e   : > { %v7636_v56 = vpop.eup %7635 }
 0x82f   : > { %v5224_v57 = vmul.f32 %v7636_v56, %v5216_v12  ;;  %v5743_v12 = vld [vmem:[%s8602_s8 + $0x20] sm:$0xff]  ;;  %v5895_v56 = vand.u32 4294901760, %v5894_v52 }
 0x830   : > { %v5771_v13 = vand.u32 4294901760, %v5743_v12 }
 0x831   : > { %v5231_v59 = vmul.f32 %v6457_v7, %v5224_v57  ;;  %v7390_v7 = vpack.c.bf16 %v5895_v56, %v5888_v53  ;;  %v7393_v57 = vpack.c.bf16 %v8388_v50, %v8386_v49 }
 0x832   : > { %v8448_v15 = vpack.c.bf16 %v5774_v14, %v5771_v13  ;;  %v8466_v22 = vsub.f32 %v5743_v12, %v5771_v13 }
 0x833   : > { %v8398_v60 = vadd.f32 %v6458_v58, %v5231_v59 }
 0x834   : > { %7376 = vmatpush3.bf16.msra.mxu1 %v8448_v15  ;;  %v5872_v38 = vand.u32 4294901760, %v8466_v22  ;;  %v7399_v59 = vpack.c.bf16 %v8468_v23, %v8466_v22 }
 0x835   : > { %v5251_v61 = vsel %vm548_vm1, %v8398_v60, 0  ;;  %7377 = vmatprep.subr.bf16.mxu1 %v7803_v0 }
 0x836   : > { %v5322_v63 = vand.u32 4294901760, %v5251_v61 }
 0x838   : > { %v5323_v2 = vsub.f32 %v5251_v61, %v5322_v63  ;;  %7379 = vmatpush3.bf16.msra.mxu1 %v8460_v19  ;;  %v7402_v61 = vpack.c.bf16 %v8473_v25, %v8471_v24 }
 0x839   : > { %7380 = vmatprep.subr.bf16.mxu1 %v7803_v0 }
 0x83a   : > { %v5324_v3 = vand.u32 4294901760, %v5323_v2 }
 0x83c   : > { %v5325_v4 = vsub.f32 %v5323_v2, %v5324_v3 }
 0x83e   : > { %v5326_v5 = vand.u32 4294901760, %v5325_v4  ;;  %v7426_v4 = vpack.c.bf16 %v5893_v45, %v5886_v44 }
 0x840   : > { %7089 = vmatmul.mubr.f32.vlgmr.msra.gmra.mrb[14].mxu0 %v5326_v5  ;;  %v6459_v5 = vld [vmem:[%s8601_s7] ss:$0 sm:$0xff] }
 0x841   : > { %7340 = vmatpush3.bf16.msra.mxu0 %v7339_v34  ;;  %7099 = vmatprep.mubr.msk.f32.mxu0 %vm7804_vm0, %v7805_v1  ;;  %v5859_v34 = vsub.f32 %v8462_v20, %v5858_v31 }
 0x842   : > { %7341 = vmatprep.subr.bf16.mxu0 %v7803_v0 }
 0x843   : > { %v5860_v36 = vand.u32 4294901760, %v5859_v34 }
 0x845   : > { %7343 = vmatpush3.bf16.msra.mxu0 %v7342_v39  ;;  %v5879_v39 = vand.u32 4294901760, %v8468_v23 }
 0x846   : > { %7344 = vmatprep.subr.bf16.mxu0 %v7803_v0 }
 0x848   : > { %7100 = vmatmul.mubr.f32.vlgmr.msra.gmra.mrb[14].mxu0 %v5322_v63 }
 0x849   : > { %7346 = vmatpush3.bf16.msra.mxu0 %v7345_v40  ;;  %7110 = vmatprep.mubr.msk.f32.mxu0 %vm7804_vm0, %v7805_v1 }
 0x84a   : > { %7347 = vmatprep.subr.bf16.mxu0 %v7803_v0 }
 0x84d   : > { %7349 = vmatpush3.bf16.msra.mxu0 %v7348_v62  ;;  %v5873_v62 = vsub.f32 %v8466_v22, %v5872_v38 }
 0x84e   : > { %7350 = vmatprep.subr.bf16.mxu0 %v7803_v0 }
 0x850   : > { %7111 = vmatmul.mubr.f32.vlgmr.msra.gmra.mrb[14].mxu0 %v5323_v2 }
 0x851   : > { %7352 = vmatpush3.bf16.msra.mxu0 %v8370_v21  ;;  %7121 = vmatprep.mubr.msk.f32.mxu0 %vm7804_vm0, %v7805_v1 }
 0x852   : > { %7353 = vmatprep.subr.bf16.mxu0 %v7803_v0 }
 0x855   : > { %7355 = vmatpush3.bf16.msra.mxu0 %v8373_v26 }
 0x856   : > { %7356 = vmatprep.subr.bf16.mxu0 %v7803_v0 }
 0x858   : > { %7122 = vmatmul.mubr.f32.vlgmr.msra.gmra.mrb[14].mxu0 %v5324_v3  ;;  %v7423_v3 = vpack.c.bf16 %v5879_v39, %v5872_v38 }
 0x859   : > { %7358 = vmatpush3.bf16.msra.mxu0 %v7357_v41  ;;  %7132 = vmatprep.mubr.msk.f32.mxu0 %vm7804_vm0, %v7805_v1  ;;  %v5880_v41 = vsub.f32 %v8468_v23, %v5879_v39 }
 0x85a   : > { %7359 = vmatprep.subr.bf16.mxu0 %v7803_v0 }
 0x85b   : > { %v5881_v43 = vand.u32 4294901760, %v5880_v41 }
 0x85d   : > { %7361 = vmatpush3.bf16.msra.mxu0 %v7360_v42  ;;  %v5874_v42 = vand.u32 4294901760, %v5873_v62 }
 0x85e   : > { %7362 = vmatprep.subr.bf16.mxu0 %v7803_v0 }
 0x85f   : > { %v7387_v47 = vpack.c.bf16 %v5881_v43, %v5874_v42 }
 0x860   : > { %7133 = vmatmul.mubr.f32.vlgmr.msra.gmra.mrb[14].mxu0 %v5322_v63 }
 0x861   : > { %7364 = vmatpush3.bf16.msra.mxu0 %v8370_v21  ;;  %7143 = vmatprep.mubr.msk.f32.mxu0 %vm7804_vm0, %v7805_v1  ;;  %v8464_v21 = vsub.f32 %v5742_v8, %v5768_v10 }
 0x862   : > { %7365 = vmatprep.subr.bf16.mxu0 %v7803_v0 }
 0x863   : > { %v5865_v32 = vand.u32 4294901760, %v8464_v21  ;;  %v7396_v58 = vpack.c.bf16 %v8464_v21, %v8462_v20 }
 0x865   : > { %7367 = vmatpush3.bf16.msra.mxu0 %v8373_v26  ;;  %v5844_v26 = vand.u32 4294901760, %v8386_v49  ;;  %v5866_v35 = vsub.f32 %v8464_v21, %v5865_v32  ;;  %v7420_v2 = vpack.c.bf16 %v5865_v32, %v5858_v31 }
 0x866   : > { %7404 = vmatprep.subr.bf16.mxu0 %v7803_v0 }
 0x867   : > { %v5845_v28 = vsub.f32 %v8386_v49, %v5844_v26  ;;  %v5867_v37 = vand.u32 4294901760, %v5866_v35 }
 0x868   : > { %7144 = vmatmul.mubr.f32.vlgmr.msra.gmra.mrb[14].mxu0 %v5322_v63  ;;  %v7417_v63 = vpack.c.bf16 %v5851_v27, %v5844_v26 }
 0x869   : > { %7406 = vmatpush3.bf16.msra.mxu0 %v8384_v48  ;;  %7219 = vmatprep.mubr.msk.f32.mxu0 %vm7804_vm0, %v7805_v1  ;;  %v5846_v55 = vand.u32 4294901760, %v5845_v28  ;;  %v7384_v40 = vpack.c.bf16 %v5867_v37, %v5860_v36 }
 0x86a   : > { %7407 = vmatprep.subr.bf16.mxu0 %v7803_v0 }
 0x86b   : > { %v7381_v33 = vpack.c.bf16 %v5853_v30, %v5846_v55 }
 0x86d   : > { %7409 = vmatpush3.bf16.msra.mxu0 %v8436_v11 }
 0x86e   : > { %7410 = vmatprep.subr.bf16.mxu0 %v7803_v0 }
 0x871   : > { %7412 = vmatpush3.bf16.msra.mxu0 %v8448_v15 }
 0x872   : > { %7413 = vmatprep.subr.bf16.mxu0 %v7803_v0 }
 0x875   : > { %7415 = vmatpush3.bf16.msra.mxu0 %v8460_v19 }
 0x876   : > { %7428 = vmatprep.subr.bf16.mxu0 %v7803_v0 }
 0x93b   : > { %v5734_v6 = vpop.f32.mrb[14].mxu0 }
 0x93c   : > { %v7442_v8 = vadd.f32 %v6459_v5, %v5734_v6  ;;  %v7145_v49 = vpop.f32.mrb[15].mxu0 }
 0x93e   : > { %v5738_v50 = vmax.f32 %v7442_v8, 0.0 }
 0x940   : > { %v5756_v9 = vsel %vm5754_vm5, %v5738_v50, 0 }
 0x941   : > { %v5831_v10 = vand.u32 4294901760, %v5756_v9 }
 0x943   : > { %v5832_v12 = vsub.f32 %v5756_v9, %v5831_v10 }
 0x945   : > { %v5833_v46 = vand.u32 4294901760, %v5832_v12 }
 0x947   : > { %7220 = vmatmul.mubr.f32.vlgmr.msra.gmra.mrb[16].mxu0 %v5833_v46  ;;  %v5834_v13 = vsub.f32 %v5832_v12, %v5833_v46 }
 0x948   : > { %7430 = vmatpush3.bf16.msra.mxu0 %v8384_v48  ;;  %7257 = vmatprep.mubr.msk.f32.mxu0 %vm7804_vm0, %v7805_v1 }
 0x949   : > { %7431 = vmatprep.subr.bf16.mxu0 %v7803_v0  ;;  %v5835_v14 = vand.u32 4294901760, %v5834_v13 }
 0x94b   : > { %7163 = vmatmul.mubr.f32.vlgmr.msra.gmra.mrb[18].mxu1 %v5835_v14 }
 0x94c   : > { %7382 = vmatpush3.bf16.msra.mxu1 %v7381_v33  ;;  %7433 = vmatpush3.bf16.msra.mxu0 %v8436_v11 }
 0x94d   : > { %7383 = vmatprep.subr.bf16.mxu1 %v7803_v0  ;;  %7434 = vmatprep.subr.bf16.mxu0 %v7803_v0 }
 0x94e   : > { %7181 = vmatprep.mubr.msk.f32.mxu1 %vm7804_vm0, %v7805_v1 }
 0x950   : > { %7385 = vmatpush3.bf16.msra.mxu1 %v7384_v40  ;;  %7436 = vmatpush3.bf16.msra.mxu0 %v8448_v15  ;;  %v6462_v40 = vld [vmem:[%s8637_s19] ss:$0 sm:$0xff] }
 0x951   : > { %7386 = vmatprep.subr.bf16.mxu1 %v7803_v0  ;;  %7437 = vmatprep.subr.bf16.mxu0 %v7803_v0 }
 0x954   : > { %7388 = vmatpush3.bf16.msra.mxu1 %v7387_v47  ;;  %7439 = vmatpush3.bf16.msra.mxu0 %v8460_v19 }
 0x955   : > { %7389 = vmatprep.subr.bf16.mxu1 %v7803_v0 }
 0x957   : > { %7258 = vmatmul.mubr.f32.vlgmr.msra.gmra.mrb[18].mxu0 %v5831_v10 }
 0x958   : > { %7391 = vmatpush3.bf16.msra.mxu1 %v7390_v7 }
 0x959   : > { %7392 = vmatprep.subr.bf16.mxu1 %v7803_v0 }
 0x95b   : > { %7182 = vmatmul.mubr.f32.vlgmr.msra.gmra.mrb[20].mxu1 %v5831_v10 }
 0x95c   : > { %7394 = vmatpush3.bf16.msra.mxu1 %v7393_v57  ;;  %7200 = vmatprep.mubr.msk.f32.mxu1 %vm7804_vm0, %v7805_v1 }
 0x95d   : > { %7395 = vmatprep.subr.bf16.mxu1 %v7803_v0 }
 0x960   : > { %7397 = vmatpush3.bf16.msra.mxu1 %v7396_v58 }
 0x961   : > { %7398 = vmatprep.subr.bf16.mxu1 %v7803_v0 }
 0x964   : > { %7400 = vmatpush3.bf16.msra.mxu1 %v7399_v59 }
 0x965   : > { %7401 = vmatprep.subr.bf16.mxu1 %v7803_v0 }
 0x968   : > { %7403 = vmatpush3.bf16.msra.mxu1 %v7402_v61 }
 0x969   : > { %7416 = vmatprep.subr.bf16.mxu1 %v7803_v0 }
 0x96b   : > { %7201 = vmatmul.mubr.f32.vlgmr.msra.gmra.mrb[22].mxu1 %v5832_v12 }
 0x96c   : > { %7418 = vmatpush3.bf16.msra.mxu1 %v7417_v63  ;;  %7238 = vmatprep.mubr.msk.f32.mxu1 %vm7804_vm0, %v7805_v1 }
 0x96d   : > { %7419 = vmatprep.subr.bf16.mxu1 %v7803_v0 }
 0x970   : > { %7421 = vmatpush3.bf16.msra.mxu1 %v7420_v2 }
 0x971   : > { %7422 = vmatprep.subr.bf16.mxu1 %v7803_v0 }
 0x974   : > { %7424 = vmatpush3.bf16.msra.mxu1 %v7423_v3 }
 0x975   : > { %7425 = vmatprep.subr.bf16.mxu1 %v7803_v0 }
 0x978   : > { %7427 = vmatpush3.bf16.msra.mxu1 %v7426_v4 }
 0x97b   : > { %7239 = vmatmul.mubr.f32.vlgmr.msra.gmra.mrb[24].mxu1 %v5831_v10 }
 0xa1a   : > { %v6117_v48 = vpop.f32.mrb[16].mxu0 }
 0xa1b   : > { %v7221_v11 = vpop.f32.mrb[17].mxu0 }
 0xa1e   : > { %v5837_v15 = vpop.f32.mrb[18].mxu1 }
 0xa1f   : > { %v7164_v16 = vpop.f32.mrb[19].mxu1  ;;  %v5838_v18 = vadd.f32 %v6460_v17, %v5837_v15 }
 0xa2a   : > { %v6291_v54 = vpop.f32.mrb[18].mxu0 }
 0xa2b   : > { %v7259_v1 = vpop.f32.mrb[19].mxu0 }
 0xa2e   : > { %v5948_v19 = vpop.f32.mrb[20].mxu1 }
 0xa2f   : > { %v5949_v20 = vadd.f32 %v5948_v19, %v5838_v18  ;;  %v7183_v21 = vpop.f32.mrb[21].mxu1 }
 0xa3e   : > { %v6036_v22 = vpop.f32.mrb[22].mxu1 }
 0xa3f   : > { %v6037_v23 = vadd.f32 %v6036_v22, %v5949_v20  ;;  %v7202_v24 = vpop.f32.mrb[23].mxu1 }
 0xa41   : > { %v6118_v0 = vadd.f32 %v6117_v48, %v6037_v23 }
 0xa4e   : > { %v6212_v25 = vpop.f32.mrb[24].mxu1 }
 0xa4f   : > { %v6213_v26 = vadd.f32 %v6212_v25, %v6118_v0  ;;  %v7240_v27 = vpop.f32.mrb[25].mxu1 }
 0xa51   : > { %v6292_v28 = vadd.f32 %v6291_v54, %v6213_v26 }
 0xa53   : > { %v6295_v29 = vadd.f32 %v6292_v28, %v8398_v60  ;;  %v6461_v60 = vld [vmem:[%s8636_s22] ss:$0 sm:$0xff]  ;;  %s7732_s22 = scalar_lea.vmem %s7731_s14, 256 }
 0xa54   : > { %p7734_p12 = scmp.lt.s32.totalorder %s7732_s22, %s7726_s26 }
 0xa55   : > { %v6298_v55 = vsel %vm548_vm1, %v6295_v29, 0.0 }
 0xa56   : > { %6299 = vadd.xlane.f32.xlu0 %v6298_v55  ;;  %p7735_p2 = por %p7734_p12, %p7733_p9 }
 0xa58   : > { %p7736_p13 = pnand %p7735_p2, %p7729_p7 }
 0xae3   : > { %v6300_v30 = vpop.xlane.xlu0 %6299 }
 0xae4   : > { %v6301_v31 = vmul.f32 0.03125, %v6300_v30 }
 0xae6   : > { %v6302_v32 = vsub.f32 %v6295_v29, %v6301_v31 }
 0xae8   : > { %v6303_v33 = vmul.f32 %v6302_v32, %v6302_v32 }
 0xaea   : > { %v6304_v34 = vsel %vm548_vm1, %v6303_v33, 0.0 }
 0xaeb   : > { %6305 = vadd.xlane.f32.xlu0 %v6304_v34 }
 0xb78   : > { %v6306_v35 = vpop.xlane.xlu0 %6305 }
 0xb79   : > { %v6307_v36 = vmul.f32 0.03125, %v6306_v35 }
 0xb7b   : > { %v6308_v37 = vadd.f32 1e-05, %v6307_v36 }
 0xb7d   : > { %7637 = vrsqrt.f32 %v6308_v37 }
 0xb87   : > { %v7638_v38 = vpop.eup %7637 }
 0xb88   : > { %v6310_v39 = vmul.f32 %v7638_v38, %v6302_v32 }
 0xb8a   : > { %v6317_v62 = vmul.f32 %v6461_v60, %v6310_v39 }
 0xb8c   : > { %v6324_v41 = vadd.f32 %v6462_v40, %v6317_v62 }
 0xb8e   : > { %6325 = vst.msk [vmem:[%s526_s25] sm:$0xff] %vm548_vm1, %v6324_v41 }
 0xb8f   : > { %7739 = shalt.err (!%p7736_p13)
}
 0xb90   : > { %s7740_s20 = scalar_lea.hbm %s8549_s1, 128  ;;  %s7744_s19 = scalar_lea.hbm %s8638_s0, 256 }
 0xb91   : > { %p7741_p6 = scmp.ne.s32.totalorder %s8549_s1, %s7740_s20  ;;  %p7745_p5 = scmp.lt.u32.totalorder %s8549_s1, %s8638_s0 }
 0xb92   : > { %p7746_p8 = scmp.lt.u32.totalorder %s7744_s19, %s7740_s20  ;;  %p7748_p0 = scmp.lt.u32.totalorder %s7740_s20, %s8549_s1 }
 0xb93   : > { %p7742_p10 = pnand %p7741_p6, %p8639_p1 }
 0xb94   : > { %p7747_p11 = por %p7746_p8, %p7745_p5 }
 0xb95   : > { %p7743_p4 = pneg %p7742_p10 }
 0xb96   : > { %p7749_p3 = por %p7748_p0, %p7747_p11 }
 0xb98   : > { %p7750_p7 = pnand %p7749_p3, %p7743_p4 }
 0xb9a   : > { %7753 = shalt.err (!%p7750_p7)
}
 0xb9b   : > { %7551 = dma.vmem_to_hbm [thread:$0]  (%p8639_p1), %s8551_s18, 128, %s8549_s1, %s6327_s24  }
 0xb9c PF: > { %s8640_s9 = sld [smem:[#allocation12_spill]]  ;;  %s8641_s12 = sld [smem:[#allocation13_spill]] }
 0xb9d   : > { %p8643_p12 = scmp.ge.s32.totalorder %s7796_s16, 2 }
 0xba2   : > { %s6352_s26 = sand.u32 1, %s8640_s9   ;;  %p8642_p9 = scmp.ne.s32.totalorder %s8641_s12, 0 }
 0xba3   : > { %s6353_s17 = scalar_lea.sflag [#allocation4], %s6352_s26 }
 0xba4   : > { %p7565_p2 = pnand %p8643_p12, %p8642_p9 }
 0xba6   : > { %7779 = dma.done.wait (!%p7565_p2), %s6353_s17, 128  }
 0xba7   : > { %7781 = vsyncadd (!%p7565_p2), %s6353_s17, 4294967168  ;;  %p28_p13 = scmp.ge.s32.totalorder %s7998_s13, 4   ;;  %s8644_s29 = smov %s7788_s30 }
 0xba8   : > { %s8645_s30 = smov %s7792_s15  ;;  %s8646_s15 = smov %s8014_s28 }
 0xba9   : > { %s8647_s16 = smov %s7998_s13  ;;  %30 = sbr.rel (!%p28_p13) target bundleno = 13 (0xd), region = 132 }
 0xbb0   :  { %6358 = vsyncpa [#allocation3], 1 }
 0xbb1   :  { %6360 = vsyncpa [#allocation3 + $0x1], 1 }
 0xbb2   :  { %6361 = vsyncpa [#allocation6], 1 }
 0xbb3   :  { %6362 = vsyncpa [#allocation4], 1 }
 0xbb4   :  { %6364 = vsyncpa [#allocation4 + $0x1], 1 }

</bundles_post_ra>
